<compile_context>
chip_gen: v6e
topology: v6e:2x2x1
jax: 0.10.0
libtpu: 0.0.40
codegen_flags: <defaults>
</compile_context>

<pallas_src>
import functools
import math

import jax
import jax.numpy as jnp
from jax.experimental import pallas as pl
from jax.experimental.pallas import tpu as pltpu


def _round_up(x, m):
    return (x + m - 1) // m * m


def _cdiv(a, b):
    return -(-a // b)


_SQRT_2_OVER_PI = math.sqrt(2.0 / math.pi)


def _gelu_tanh(x):
    return 0.5 * x * (1.0 + jnp.tanh(_SQRT_2_OVER_PI * (x + 0.044715 * x * x * x)))


# ---------------------------------------------------------------------------
# Kernel 1: conv1 (im2col matmul) + bias + LayerNorm(channels) + GELU, fused.
# ---------------------------------------------------------------------------
def _conv1_ln_gelu_kernel(p_ref, w_ref, b_ref, g_ref, bt_ref, o_ref, *, c_out, eps):
    # p_ref : (1, TR, W1, 9*Cin) compute dtype  (conv1 patches, tap-major)
    # w_ref : (9*Cin, Dp)        compute dtype
    # b/g/bt: (1, Dp)            f32 (bias / LN gamma / LN beta, zero padded)
    # o_ref : (1, TR, W1, Dp)    compute dtype
    _, tr, w1, k = p_ref.shape
    dp = o_ref.shape[3]

    p = p_ref[...].reshape(tr * w1, k)
    h = jnp.dot(p, w_ref[...], preferred_element_type=jnp.float32) + b_ref[...]

    # LayerNorm over the real c_out channels.  Padded lanes of h are exactly 0
    # (w1 padded columns and b1 padded entries are zero), so the statistics need
    # no mask; variance via E[x^2] - mean^2 in f32.
    inv_c = 1.0 / c_out
    mean = jnp.sum(h, axis=-1, keepdims=True) * inv_c
    ex2 = jnp.sum(h * h, axis=-1, keepdims=True) * inv_c
    var = jnp.maximum(ex2 - mean * mean, 0.0)
    rstd = jax.lax.rsqrt(var + eps)
    y = (h - mean) * rstd * g_ref[...] + bt_ref[...]   # padded lanes stay exactly 0

    o_ref[...] = _gelu_tanh(y).reshape(1, tr, w1, dp).astype(o_ref.dtype)


# ---------------------------------------------------------------------------
# Kernel 2: conv2 (3x3, stride 1) as 9 shifted MXU matmuls over a manually
# DMA'd, halo'd row tile of the un-expanded NHWC feature map (P4 pattern).
# ---------------------------------------------------------------------------
def _conv2_kernel(y1p_hbm, w_ref, b_ref, o_ref, buf, sem, *, tr, w1, dp, hp):
    # y1p_hbm: (N*(Hp+2), W1+2, Dp) compute dtype, raw HBM ref (spatially
    #          zero-padded NHWC feature map, batch folded into the row axis)
    # w_ref  : (9*Dp, Dp)           compute dtype (tap-major conv2 weights)
    # b_ref  : (1, Dp)              f32
    # o_ref  : (1, TR, W1, Dp)      f32
    # buf    : (2, TR+2, W1+2, Dp)  compute dtype VMEM double buffer
    # sem    : DMA semaphores (2,)
    ni = pl.program_id(0)
    rb = pl.program_id(1)
    nrb = pl.num_programs(1)

    def start_fetch(row_block, slot):
        row0 = ni * (hp + 2) + row_block * tr
        pltpu.make_async_copy(
            y1p_hbm.at[pl.ds(row0, tr + 2)], buf.at[slot], sem.at[slot]
        ).start()

    # Prime the pipeline at the first row block of every image (stays correct
    # even if the batch axis is sharded across TensorCores).
    @pl.when(rb == 0)
    def _():
        start_fetch(0, 0)

    slot = rb % 2
    pltpu.make_async_copy(
        y1p_hbm.at[pl.ds(0, tr + 2)], buf.at[slot], sem.at[slot]
    ).wait()

    # Prefetch the next row block of the same image into the other slot.
    @pl.when(rb + 1 < nrb)
    def _():
        start_fetch(rb + 1, 1 - slot)

    win = buf[slot]                                     # (TR+2, W1+2, Dp)

    acc = None
    for k in range(9):
        kh, kw = divmod(k, 3)
        tap = win[kh:kh + tr, kw:kw + w1, :].reshape(tr * w1, dp)
        part = jnp.dot(tap, w_ref[k * dp:(k + 1) * dp, :],
                       preferred_element_type=jnp.float32)
        acc = part if acc is None else acc + part

    o_ref[...] = (acc + b_ref[...]).reshape(1, tr, w1, dp).astype(o_ref.dtype)


# ---------------------------------------------------------------------------
# One-time parameter layout prep (hoisted out of the forward pass).
# ---------------------------------------------------------------------------
def prepare_stem_params(conv1_w, conv1_b, gamma, beta, conv2_w, conv2_b,
                        compute_dtype=jnp.bfloat16, lane_multiple=128):
    """OIHW conv weights -> tap-major (K, Dp) matrices, output dim padded to a
    128-lane multiple (lane-dense stores).  Streamed weights are stored in
    `compute_dtype`; bias / LN affine stay f32 (applied on the f32 accumulator).
    conv2's per-tap input dim is padded to Dp as well: the padded y1 lanes are
    exactly zero, and for out_chs <= 128 the MXU contraction granularity makes
    the extra K rows free (no wrapper-side K-padded patch stream exists anymore).
    """
    d, c_in = conv1_w.shape[0], conv1_w.shape[1]
    dp = _round_up(d, lane_multiple)
    pad_d = dp - d

    w1 = jnp.transpose(conv1_w, (2, 3, 1, 0)).reshape(9 * c_in, d)
    w1 = jnp.pad(w1, ((0, 0), (0, pad_d))).astype(compute_dtype)
    b1 = jnp.pad(conv1_b, (0, pad_d)).reshape(1, dp).astype(jnp.float32)
    g = jnp.pad(gamma, (0, pad_d)).reshape(1, dp).astype(jnp.float32)
    bt = jnp.pad(beta, (0, pad_d)).reshape(1, dp).astype(jnp.float32)

    w2 = jnp.transpose(conv2_w, (2, 3, 1, 0))                    # (3,3,Cin,Cout)
    w2 = jnp.pad(w2, ((0, 0), (0, 0), (0, pad_d), (0, pad_d)))
    w2 = w2.reshape(9 * dp, dp).astype(compute_dtype)
    b2 = jnp.pad(conv2_b, (0, pad_d)).reshape(1, dp).astype(jnp.float32)

    return {"w1": w1, "b1": b1, "gamma": g, "beta": bt, "w2": w2, "b2": b2}


# ---------------------------------------------------------------------------
# Forward pass.
# ---------------------------------------------------------------------------
@functools.partial(jax.jit, static_argnames=("c_out", "block_m", "eps"))
def stem_forward(x, params, *, c_out, block_m=512, eps=1e-6):
    """Stem.forward: conv1(s2) -> LayerNorm2d+GELU -> conv2(s1).  NCHW in/out."""
    n, c_in, h, w = x.shape
    dp = params["w1"].shape[1]
    compute_dtype = params["w1"].dtype
    h1 = (h - 1) // 2 + 1
    w1_ = (w - 1) // 2 + 1

    # Row tiling: TR feature-map rows per grid step (~block_m matmul rows/step).
    tr = max(1, min(h1, block_m // max(w1_, 1)))
    rb = _cdiv(h1, tr)
    hp = rb * tr                                    # row-padded height

    # ---- glue: im2col for conv1 (3x3, stride 2, pad 1), NHWC tap-major ------
    xc = jnp.transpose(x, (0, 2, 3, 1)).astype(compute_dtype)
    xp = jnp.pad(xc, ((0, 0), (1, 1), (1, 1), (0, 0)))
    taps1 = [xp[:, kh:kh + 2 * h1 - 1:2, kw:kw + 2 * w1_ - 1:2, :]
             for kh in range(3) for kw in range(3)]
    p1 = jnp.concatenate(taps1, axis=-1)            # (N, H1, W1, 9*Cin)
    p1 = jnp.pad(p1, ((0, 0), (0, hp - h1), (0, 0), (0, 0)))

    # ---- Pallas kernel 1: conv1 matmul + bias + LayerNorm(channels) + GELU --
    y1 = pl.pallas_call(
        functools.partial(_conv1_ln_gelu_kernel, c_out=c_out, eps=eps),
        out_shape=jax.ShapeDtypeStruct((n, hp, w1_, dp), compute_dtype),
        grid_spec=pltpu.PrefetchScalarGridSpec(
            num_scalar_prefetch=0,
            grid=(n, rb),
            in_specs=[
                pl.BlockSpec((1, tr, w1_, 9 * c_in), lambda ni, ri: (ni, ri, 0, 0)),
                pl.BlockSpec((9 * c_in, dp), lambda ni, ri: (0, 0)),
                pl.BlockSpec((1, dp), lambda ni, ri: (0, 0)),
                pl.BlockSpec((1, dp), lambda ni, ri: (0, 0)),
                pl.BlockSpec((1, dp), lambda ni, ri: (0, 0)),
            ],
            out_specs=pl.BlockSpec((1, tr, w1_, dp), lambda ni, ri: (ni, ri, 0, 0)),
        ),
        compiler_params=pltpu.CompilerParams(
            dimension_semantics=("parallel", "parallel")),
    )(p1, params["w1"], params["b1"], params["gamma"], params["beta"])

    # ---- glue: spatial zero halo around the UN-expanded feature map ---------
    # Rows >= h1 of y1 are LayerNorm-of-zeros garbage -> slice before padding.
    y1p = jnp.pad(y1[:, :h1], ((0, 0), (1, 1 + hp - h1), (1, 1), (0, 0)))
    y1p = y1p.reshape(n * (hp + 2), w1_ + 2, dp)     # fold batch into the rows

    # ---- Pallas kernel 2: conv2 via in-kernel halo DMA + 9 shifted matmuls --
    out2 = pl.pallas_call(
        functools.partial(_conv2_kernel, tr=tr, w1=w1_, dp=dp, hp=hp),
        out_shape=jax.ShapeDtypeStruct((n, hp, w1_, dp), jnp.float32),
        grid_spec=pltpu.PrefetchScalarGridSpec(
            num_scalar_prefetch=0,
            grid=(n, rb),
            in_specs=[
                pl.BlockSpec(memory_space=pl.ANY),   # raw HBM ref, manual DMA
                pl.BlockSpec((9 * dp, dp), lambda ni, ri: (0, 0)),
                pl.BlockSpec((1, dp), lambda ni, ri: (0, 0)),
            ],
            out_specs=pl.BlockSpec((1, tr, w1_, dp), lambda ni, ri: (ni, ri, 0, 0)),
            scratch_shapes=[
                pltpu.VMEM((2, tr + 2, w1_ + 2, dp), compute_dtype),
                pltpu.SemaphoreType.DMA((2,)),
            ],
        ),
        compiler_params=pltpu.CompilerParams(
            # Batch axis may shard across TensorCores (keep N even on v7x for
            # load balance); the per-image DMA pipeline is primed at rb == 0 so
            # that stays correct.  The row-block axis carries the manual
            # double-buffer state, so it is sequential ("arbitrary").
            dimension_semantics=("parallel", "arbitrary")),
    )(y1p, params["w2"], params["b2"])

    # Final channel slice + NCHW transpose (kept for parity with the PyTorch
    # module; an NHWC consumer could take out2[:, :h1, :, :c_out] directly).
    out = out2[:, :h1, :, :c_out]
    return jnp.transpose(out, (0, 3, 1, 2))


def _reference_stem(x, conv1_w, conv1_b, gamma, beta, conv2_w, conv2_b, eps):
    y = jax.lax.conv_general_dilated(
        x, conv1_w, window_strides=(2, 2), padding=((1, 1), (1, 1)),
        dimension_numbers=("NCHW", "OIHW", "NCHW"),
    ) + conv1_b.reshape(1, -1, 1, 1)
    mu = jnp.mean(y, axis=1, keepdims=True)
    var = jnp.var(y, axis=1, keepdims=True)
    y = (y - mu) * jax.lax.rsqrt(var + eps)
    y = y * gamma.reshape(1, -1, 1, 1) + beta.reshape(1, -1, 1, 1)
    y = jax.nn.gelu(y, approximate=True)
    y = jax.lax.conv_general_dilated(
        y, conv2_w, window_strides=(1, 1), padding=((1, 1), (1, 1)),
        dimension_numbers=("NCHW", "OIHW", "NCHW"),
    ) + conv2_b.reshape(1, -1, 1, 1)
    return y


if __name__ == "__main__":
    # Small shapes consistent with the module: batch=2, in_chs=4, 16x16 input,
    # out_chs=32 -> output (2, 32, 8, 8).
    N, C_IN, H, W = 2, 4, 16, 16
    C_OUT = 32
    EPS = 1e-6

    key = jax.random.PRNGKey(0)
    ks = jax.random.split(key, 7)
    x = jax.random.normal(ks[0], (N, C_IN, H, W), dtype=jnp.float32)
    conv1_w = jax.random.normal(ks[1], (C_OUT, C_IN, 3, 3), jnp.float32) / math.sqrt(9 * C_IN)
    conv1_b = jax.random.normal(ks[2], (C_OUT,), jnp.float32) * 0.02
    gamma = 1.0 + 0.1 * jax.random.normal(ks[3], (C_OUT,), jnp.float32)
    beta = 0.02 * jax.random.normal(ks[4], (C_OUT,), jnp.float32)
    conv2_w = jax.random.normal(ks[5], (C_OUT, C_OUT, 3, 3), jnp.float32) / math.sqrt(9 * C_OUT)
    conv2_b = jax.random.normal(ks[6], (C_OUT,), jnp.float32) * 0.02

    ref = jax.block_until_ready(
        _reference_stem(x, conv1_w, conv1_b, gamma, beta, conv2_w, conv2_b, EPS))

    # block_m=32 -> TR=4 rows per step, 2 row blocks per image: exercises the
    # multi-step grid and the manual halo double-buffer even at demo scale.

    # f32 streaming path: tight check of the kernel math.
    params_f32 = prepare_stem_params(conv1_w, conv1_b, gamma, beta, conv2_w,
                                     conv2_b, compute_dtype=jnp.float32)
    out_f32 = jax.block_until_ready(
        stem_forward(x, params_f32, c_out=C_OUT, block_m=32, eps=EPS))
    assert out_f32.shape == (N, C_OUT, H // 2, W // 2), out_f32.shape
    err_f32 = float(jnp.max(jnp.abs(out_f32 - ref)))
    assert jnp.allclose(out_f32, ref, atol=1e-4, rtol=1e-4), err_f32

    # bf16 streaming path (production default): looser tolerance because the
    # intermediate feature map / weights are bf16 (accumulation stays f32).
    params_bf16 = prepare_stem_params(conv1_w, conv1_b, gamma, beta, conv2_w,
                                      conv2_b, compute_dtype=jnp.bfloat16)
    out_bf16 = jax.block_until_ready(
        stem_forward(x, params_bf16, c_out=C_OUT, block_m=32, eps=EPS))
    assert out_bf16.shape == (N, C_OUT, H // 2, W // 2), out_bf16.shape
    err_bf16 = float(jnp.max(jnp.abs(out_bf16 - ref)))
    assert jnp.allclose(out_bf16, ref, atol=7e-2, rtol=7e-2), err_bf16

    print("KERNEL_OK")
</pallas_src>

<mosaic_0001>
module attributes {stable_mosaic.version = 11 : i64} {
  func.func @_conv1_ln_gelu_kernel(%arg0: i32, %arg1: i32, %arg2: memref<1x4x8x36xf32, #tpu.memory_space<vmem>>, %arg3: memref<36x128xf32, #tpu.memory_space<vmem>>, %arg4: memref<1x128xf32, #tpu.memory_space<vmem>>, %arg5: memref<1x128xf32, #tpu.memory_space<vmem>>, %arg6: memref<1x128xf32, #tpu.memory_space<vmem>>, %arg7: memref<1x4x8x128xf32, #tpu.memory_space<vmem>>) attributes {dimension_semantics = [#tpu.dimension_semantics<parallel>, #tpu.dimension_semantics<parallel>], iteration_bounds = array<i64: 2, 2>, scalar_prefetch = 0 : i64, scratch_operands = 0 : i64, tpu.core_type = #tpu.core_type<tc>, window_params = [{transform_indices = @transform_0, window_bounds = array<i64: 1, 4, 8, 36>}, {pipeline_mode = #tpu.pipeline_mode<synchronous>, transform_indices = @transform_1, window_bounds = array<i64: 36, 128>}, {pipeline_mode = #tpu.pipeline_mode<synchronous>, transform_indices = @transform_2, window_bounds = array<i64: 1, 128>}, {pipeline_mode = #tpu.pipeline_mode<synchronous>, transform_indices = @transform_3, window_bounds = array<i64: 1, 128>}, {pipeline_mode = #tpu.pipeline_mode<synchronous>, transform_indices = @transform_4, window_bounds = array<i64: 1, 128>}, {transform_indices = @transform_5, window_bounds = array<i64: 1, 4, 8, 128>}]} {
    %c0 = arith.constant 0 : index
    %c0_0 = arith.constant 0 : index
    %c0_1 = arith.constant 0 : index
    %c0_2 = arith.constant 0 : index
    %0 = vector.load %arg2[%c0, %c0_0, %c0_1, %c0_2] : memref<1x4x8x36xf32, #tpu.memory_space<vmem>>, vector<1x4x8x36xf32>
    %1 = vector.shape_cast %0 : vector<1x4x8x36xf32> to vector<32x36xf32>
    %c0_3 = arith.constant 0 : index
    %c0_4 = arith.constant 0 : index
    %2 = vector.load %arg3[%c0_3, %c0_4] : memref<36x128xf32, #tpu.memory_space<vmem>>, vector<36x128xf32>
    %cst = arith.constant dense<0.000000e+00> : vector<32x128xf32>
    %3 = tpu.matmul %1, %2, %cst {dimension_numbers = #tpu.dot_dimension_numbers<[1], [0], [0], [1], [0, 0, 1, 1], [], []>} : vector<32x36xf32>, vector<36x128xf32>, vector<32x128xf32> -> vector<32x128xf32>
    %c0_5 = arith.constant 0 : index
    %c0_6 = arith.constant 0 : index
    %4 = vector.load %arg4[%c0_5, %c0_6] : memref<1x128xf32, #tpu.memory_space<vmem>>, vector<1x128xf32>
    %5 = vector.broadcast %4 : vector<1x128xf32> to vector<32x128xf32>
    %6 = arith.addf %3, %5 : vector<32x128xf32>
    %cst_7 = arith.constant dense<0.000000e+00> : vector<32xf32>
    %7 = vector.multi_reduction <add>, %6, %cst_7 [1] : vector<32x128xf32> to vector<32xf32>
    %8 = vector.shape_cast %7 : vector<32xf32> to vector<32x1xf32>
    %cst_8 = arith.constant 3.125000e-02 : f32
    %9 = vector.broadcast %cst_8 : f32 to vector<32x1xf32>
    %10 = arith.mulf %8, %9 : vector<32x1xf32>
    %11 = arith.mulf %6, %6 : vector<32x128xf32>
    %cst_9 = arith.constant dense<0.000000e+00> : vector<32xf32>
    %12 = vector.multi_reduction <add>, %11, %cst_9 [1] : vector<32x128xf32> to vector<32xf32>
    %13 = vector.shape_cast %12 : vector<32xf32> to vector<32x1xf32>
    %cst_10 = arith.constant 3.125000e-02 : f32
    %14 = vector.broadcast %cst_10 : f32 to vector<32x1xf32>
    %15 = arith.mulf %13, %14 : vector<32x1xf32>
    %16 = arith.mulf %10, %10 : vector<32x1xf32>
    %17 = arith.subf %15, %16 : vector<32x1xf32>
    %cst_11 = arith.constant 0.000000e+00 : f32
    %18 = vector.broadcast %cst_11 : f32 to vector<32x1xf32>
    %19 = arith.maximumf %17, %18 : vector<32x1xf32>
    %cst_12 = arith.constant 9.99999997E-7 : f32
    %20 = vector.broadcast %cst_12 : f32 to vector<32x1xf32>
    %21 = arith.addf %19, %20 : vector<32x1xf32>
    %22 = math.rsqrt %21 : vector<32x1xf32>
    %23 = vector.broadcast %10 : vector<32x1xf32> to vector<32x128xf32>
    %24 = arith.subf %6, %23 : vector<32x128xf32>
    %25 = vector.broadcast %22 : vector<32x1xf32> to vector<32x128xf32>
    %26 = arith.mulf %24, %25 : vector<32x128xf32>
    %c0_13 = arith.constant 0 : index
    %c0_14 = arith.constant 0 : index
    %27 = vector.load %arg5[%c0_13, %c0_14] : memref<1x128xf32, #tpu.memory_space<vmem>>, vector<1x128xf32>
    %28 = vector.broadcast %27 : vector<1x128xf32> to vector<32x128xf32>
    %29 = arith.mulf %26, %28 : vector<32x128xf32>
    %c0_15 = arith.constant 0 : index
    %c0_16 = arith.constant 0 : index
    %30 = vector.load %arg6[%c0_15, %c0_16] : memref<1x128xf32, #tpu.memory_space<vmem>>, vector<1x128xf32>
    %31 = vector.broadcast %30 : vector<1x128xf32> to vector<32x128xf32>
    %32 = arith.addf %29, %31 : vector<32x128xf32>
    %cst_17 = arith.constant 5.000000e-01 : f32
    %33 = vector.broadcast %cst_17 : f32 to vector<32x128xf32>
    %34 = arith.mulf %33, %32 : vector<32x128xf32>
    %cst_18 = arith.constant 4.471500e-02 : f32
    %35 = vector.broadcast %cst_18 : f32 to vector<32x128xf32>
    %36 = arith.mulf %35, %32 : vector<32x128xf32>
    %37 = arith.mulf %36, %32 : vector<32x128xf32>
    %38 = arith.mulf %37, %32 : vector<32x128xf32>
    %39 = arith.addf %32, %38 : vector<32x128xf32>
    %cst_19 = arith.constant 0.797884583 : f32
    %40 = vector.broadcast %cst_19 : f32 to vector<32x128xf32>
    %41 = arith.mulf %40, %39 : vector<32x128xf32>
    %42 = math.tanh %41 : vector<32x128xf32>
    %cst_20 = arith.constant 1.000000e+00 : f32
    %43 = vector.broadcast %cst_20 : f32 to vector<32x128xf32>
    %44 = arith.addf %43, %42 : vector<32x128xf32>
    %45 = arith.mulf %34, %44 : vector<32x128xf32>
    %46 = vector.shape_cast %45 : vector<32x128xf32> to vector<1x4x8x128xf32>
    %c0_21 = arith.constant 0 : index
    %c0_22 = arith.constant 0 : index
    %c0_23 = arith.constant 0 : index
    %c0_24 = arith.constant 0 : index
    %47 = vector.load %arg7[%c0_21, %c0_22, %c0_23, %c0_24] : memref<1x4x8x128xf32, #tpu.memory_space<vmem>>, vector<1x4x8x128xf32>
    tpu.vector_store %arg7[%c0_21, %c0_22, %c0_23, %c0_24], %46 {strides = array<i32>} : memref<1x4x8x128xf32, #tpu.memory_space<vmem>>, vector<1x4x8x128xf32>,
    return
  }
  func.func @transform_0(%arg0: i32, %arg1: i32) -> (i32, i32, i32, i32) {
    %c0_i32 = arith.constant 0 : i32
    %c0_i32_0 = arith.constant 0 : i32
    %c0_i32_1 = arith.constant 0 : i32
    return %arg0, %arg1, %c0_i32, %c0_i32_0 : i32, i32, i32, i32
  }
  func.func @transform_1(%arg0: i32, %arg1: i32) -> (i32, i32) {
    %c0_i32 = arith.constant 0 : i32
    %c0_i32_0 = arith.constant 0 : i32
    %c0_i32_1 = arith.constant 0 : i32
    return %c0_i32, %c0_i32_0 : i32, i32
  }
  func.func @transform_2(%arg0: i32, %arg1: i32) -> (i32, i32) {
    %c0_i32 = arith.constant 0 : i32
    %c0_i32_0 = arith.constant 0 : i32
    %c0_i32_1 = arith.constant 0 : i32
    return %c0_i32, %c0_i32_0 : i32, i32
  }
  func.func @transform_3(%arg0: i32, %arg1: i32) -> (i32, i32) {
    %c0_i32 = arith.constant 0 : i32
    %c0_i32_0 = arith.constant 0 : i32
    %c0_i32_1 = arith.constant 0 : i32
    return %c0_i32, %c0_i32_0 : i32, i32
  }
  func.func @transform_4(%arg0: i32, %arg1: i32) -> (i32, i32) {
    %c0_i32 = arith.constant 0 : i32
    %c0_i32_0 = arith.constant 0 : i32
    %c0_i32_1 = arith.constant 0 : i32
    return %c0_i32, %c0_i32_0 : i32, i32
  }
  func.func @transform_5(%arg0: i32, %arg1: i32) -> (i32, i32, i32, i32) {
    %c0_i32 = arith.constant 0 : i32
    %c0_i32_0 = arith.constant 0 : i32
    %c0_i32_1 = arith.constant 0 : i32
    return %arg0, %arg1, %c0_i32, %c0_i32_0 : i32, i32, i32, i32
  }
}

module attributes {stable_mosaic.version = 11 : i64} {
  func.func @_conv2_kernel(%arg0: i32, %arg1: i32, %arg2: memref<20x10x128xf32, #tpu.memory_space<any>>, %arg3: memref<1152x128xf32, #tpu.memory_space<vmem>>, %arg4: memref<1x128xf32, #tpu.memory_space<vmem>>, %arg5: memref<1x4x8x128xf32, #tpu.memory_space<vmem>>, %arg6: memref<2x6x10x128xf32, #tpu.memory_space<vmem>>, %arg7: memref<2x!tpu.dma_semaphore, #tpu.memory_space<semaphore_mem>>) attributes {dimension_semantics = [#tpu.dimension_semantics<parallel>, #tpu.dimension_semantics<arbitrary>], iteration_bounds = array<i64: 2, 2>, scalar_prefetch = 0 : i64, scratch_operands = 2 : i64, tpu.core_type = #tpu.core_type<tc>, window_params = [{}, {pipeline_mode = #tpu.pipeline_mode<synchronous>, transform_indices = @transform_1, window_bounds = array<i64: 1152, 128>}, {pipeline_mode = #tpu.pipeline_mode<synchronous>, transform_indices = @transform_2, window_bounds = array<i64: 1, 128>}, {transform_indices = @transform_3, window_bounds = array<i64: 1, 4, 8, 128>}]} {
    %c0_i32 = arith.constant 0 : i32
    %0 = arith.cmpi eq, %arg1, %c0_i32 : i32
    %1 = arith.extui %0 : i1 to i32
    %c0_i32_0 = arith.constant 0 : i32
    %2 = arith.cmpi ne, %1, %c0_i32_0 : i32
    scf.if %2 {
      %c10_i32 = arith.constant 10 : i32
      %74 = arith.muli %arg0, %c10_i32 : i32
      %c0_i32_40 = arith.constant 0 : i32
      %75 = arith.addi %74, %c0_i32_40 : i32
      %c0_i32_41 = arith.constant 0 : i32
      %c0_i32_42 = arith.constant 0 : i32
      %c0_i32_43 = arith.constant 0 : i32
      %c0_i32_44 = arith.constant 0 : i32
      %76 = tpu.memref_slice %arg2[%75, %c0_i32_43, %c0_i32_44] : memref<20x10x128xf32, #tpu.memory_space<any>> -> memref<6x10x128xf32, #tpu.memory_space<any>>
      %c0_i32_45 = arith.constant 0 : i32
      %c0_i32_46 = arith.constant 0 : i32
      %c0_i32_47 = arith.constant 0 : i32
      %77 = tpu.memref_slice %arg6[%c0_i32_41, %c0_i32_45, %c0_i32_46, %c0_i32_47] : memref<2x6x10x128xf32, #tpu.memory_space<vmem>> -> memref<1x6x10x128xf32, #tpu.memory_space<vmem>>
      %78 = tpu.memref_squeeze %77 : memref<1x6x10x128xf32, #tpu.memory_space<vmem>> -> memref<6x10x128xf32, #tpu.memory_space<vmem>>
      %79 = tpu.memref_slice %arg7[%c0_i32_42] : memref<2x!tpu.dma_semaphore, #tpu.memory_space<semaphore_mem>> -> memref<1x!tpu.dma_semaphore, #tpu.memory_space<semaphore_mem>>
      %80 = tpu.memref_squeeze %79 : memref<1x!tpu.dma_semaphore, #tpu.memory_space<semaphore_mem>> -> memref<!tpu.dma_semaphore, #tpu.memory_space<semaphore_mem>>
      tpu.enqueue_dma source(%76 : memref<6x10x128xf32, #tpu.memory_space<any>>) target(%78 : memref<6x10x128xf32, #tpu.memory_space<vmem>>) target_semaphore(%80 : memref<!tpu.dma_semaphore, #tpu.memory_space<semaphore_mem>>)
    } else {
    }
    %c2_i32 = arith.constant 2 : i32
    %c0_i32_1 = arith.constant 0 : i32
    %3 = arith.cmpi eq, %c2_i32, %c0_i32_1 : i32
    %c1_i32 = arith.constant 1 : i32
    %4 = arith.select %3, %c1_i32, %c2_i32 : i32
    %5 = arith.remsi %arg1, %4 : i32
    %c0_i32_2 = arith.constant 0 : i32
    %6 = arith.cmpi ne, %5, %c0_i32_2 : i32
    %c0_i32_3 = arith.constant 0 : i32
    %7 = arith.cmpi slt, %5, %c0_i32_3 : i32
    %c0_i32_4 = arith.constant 0 : i32
    %8 = arith.cmpi slt, %4, %c0_i32_4 : i32
    %9 = arith.xori %7, %8 : i1
    %10 = arith.andi %9, %6 : i1
    %11 = arith.addi %5, %4 : i32
    %12 = arith.select %10, %11, %5 : i32
    %c0_i32_5 = arith.constant 0 : i32
    %c0_i32_6 = arith.constant 0 : i32
    %c0_i32_7 = arith.constant 0 : i32
    %13 = tpu.memref_slice %arg2[%c0_i32_5, %c0_i32_6, %c0_i32_7] : memref<20x10x128xf32, #tpu.memory_space<any>> -> memref<6x10x128xf32, #tpu.memory_space<any>>
    %c0_i32_8 = arith.constant 0 : i32
    %c0_i32_9 = arith.constant 0 : i32
    %c0_i32_10 = arith.constant 0 : i32
    %14 = tpu.memref_slice %arg6[%12, %c0_i32_8, %c0_i32_9, %c0_i32_10] : memref<2x6x10x128xf32, #tpu.memory_space<vmem>> -> memref<1x6x10x128xf32, #tpu.memory_space<vmem>>
    %15 = tpu.memref_squeeze %14 : memref<1x6x10x128xf32, #tpu.memory_space<vmem>> -> memref<6x10x128xf32, #tpu.memory_space<vmem>>
    %16 = tpu.memref_slice %arg7[%12] : memref<2x!tpu.dma_semaphore, #tpu.memory_space<semaphore_mem>> -> memref<1x!tpu.dma_semaphore, #tpu.memory_space<semaphore_mem>>
    %17 = tpu.memref_squeeze %16 : memref<1x!tpu.dma_semaphore, #tpu.memory_space<semaphore_mem>> -> memref<!tpu.dma_semaphore, #tpu.memory_space<semaphore_mem>>
    tpu.wait_dma2 semaphore(%17 : memref<!tpu.dma_semaphore, #tpu.memory_space<semaphore_mem>>) src(%13 : memref<6x10x128xf32, #tpu.memory_space<any>>) dst(%15 : memref<6x10x128xf32, #tpu.memory_space<vmem>>)
    %c1_i32_11 = arith.constant 1 : i32
    %18 = arith.addi %arg1, %c1_i32_11 : i32
    %c2_i32_12 = arith.constant 2 : i32
    %19 = arith.cmpi slt, %18, %c2_i32_12 : i32
    %20 = arith.extui %19 : i1 to i32
    %c0_i32_13 = arith.constant 0 : i32
    %21 = arith.cmpi ne, %20, %c0_i32_13 : i32
    scf.if %21 {
      %c1_i32_40 = arith.constant 1 : i32
      %74 = arith.addi %arg1, %c1_i32_40 : i32
      %c1_i32_41 = arith.constant 1 : i32
      %75 = arith.subi %c1_i32_41, %12 : i32
      %c10_i32 = arith.constant 10 : i32
      %76 = arith.muli %arg0, %c10_i32 : i32
      %c4_i32 = arith.constant 4 : i32
      %77 = arith.muli %74, %c4_i32 : i32
      %78 = arith.addi %76, %77 : i32
      %c0_i32_42 = arith.constant 0 : i32
      %c0_i32_43 = arith.constant 0 : i32
      %79 = tpu.memref_slice %arg2[%78, %c0_i32_42, %c0_i32_43] : memref<20x10x128xf32, #tpu.memory_space<any>> -> memref<6x10x128xf32, #tpu.memory_space<any>>
      %c0_i32_44 = arith.constant 0 : i32
      %c0_i32_45 = arith.constant 0 : i32
      %c0_i32_46 = arith.constant 0 : i32
      %80 = tpu.memref_slice %arg6[%75, %c0_i32_44, %c0_i32_45, %c0_i32_46] : memref<2x6x10x128xf32, #tpu.memory_space<vmem>> -> memref<1x6x10x128xf32, #tpu.memory_space<vmem>>
      %81 = tpu.memref_squeeze %80 : memref<1x6x10x128xf32, #tpu.memory_space<vmem>> -> memref<6x10x128xf32, #tpu.memory_space<vmem>>
      %82 = tpu.memref_slice %arg7[%75] : memref<2x!tpu.dma_semaphore, #tpu.memory_space<semaphore_mem>> -> memref<1x!tpu.dma_semaphore, #tpu.memory_space<semaphore_mem>>
      %83 = tpu.memref_squeeze %82 : memref<1x!tpu.dma_semaphore, #tpu.memory_space<semaphore_mem>> -> memref<!tpu.dma_semaphore, #tpu.memory_space<semaphore_mem>>
      tpu.enqueue_dma source(%79 : memref<6x10x128xf32, #tpu.memory_space<any>>) target(%81 : memref<6x10x128xf32, #tpu.memory_space<vmem>>) target_semaphore(%83 : memref<!tpu.dma_semaphore, #tpu.memory_space<semaphore_mem>>)
    } else {
    }
    %22 = arith.index_cast %12 : i32 to index
    %c0 = arith.constant 0 : index
    %c0_14 = arith.constant 0 : index
    %c0_15 = arith.constant 0 : index
    %23 = vector.load %arg6[%22, %c0, %c0_14, %c0_15] : memref<2x6x10x128xf32, #tpu.memory_space<vmem>>, vector<1x6x10x128xf32>
    %24 = vector.shape_cast %23 : vector<1x6x10x128xf32> to vector<6x10x128xf32>
    %25 = vector.extract_strided_slice %24 {offsets = [0, 0, 0], sizes = [4, 8, 128], strides = [1, 1, 1]} : vector<6x10x128xf32> to vector<4x8x128xf32>
    %26 = vector.shape_cast %25 : vector<4x8x128xf32> to vector<32x128xf32>
    %c0_16 = arith.constant 0 : index
    %c0_17 = arith.constant 0 : index
    %27 = vector.load %arg3[%c0_16, %c0_17] : memref<1152x128xf32, #tpu.memory_space<vmem>>, vector<128x128xf32>
    %cst = arith.constant dense<0.000000e+00> : vector<32x128xf32>
    %28 = tpu.matmul %26, %27, %cst {dimension_numbers = #tpu.dot_dimension_numbers<[1], [0], [0], [1], [0, 0, 1, 1], [], []>} : vector<32x128xf32>, vector<128x128xf32>, vector<32x128xf32> -> vector<32x128xf32>
    %29 = vector.extract_strided_slice %24 {offsets = [0, 1, 0], sizes = [4, 8, 128], strides = [1, 1, 1]} : vector<6x10x128xf32> to vector<4x8x128xf32>
    %30 = vector.shape_cast %29 : vector<4x8x128xf32> to vector<32x128xf32>
    %c128 = arith.constant 128 : index
    %c0_18 = arith.constant 0 : index
    %31 = vector.load %arg3[%c128, %c0_18] : memref<1152x128xf32, #tpu.memory_space<vmem>>, vector<128x128xf32>
    %cst_19 = arith.constant dense<0.000000e+00> : vector<32x128xf32>
    %32 = tpu.matmul %30, %31, %cst_19 {dimension_numbers = #tpu.dot_dimension_numbers<[1], [0], [0], [1], [0, 0, 1, 1], [], []>} : vector<32x128xf32>, vector<128x128xf32>, vector<32x128xf32> -> vector<32x128xf32>
    %33 = arith.addf %28, %32 : vector<32x128xf32>
    %34 = vector.extract_strided_slice %24 {offsets = [0, 2, 0], sizes = [4, 8, 128], strides = [1, 1, 1]} : vector<6x10x128xf32> to vector<4x8x128xf32>
    %35 = vector.shape_cast %34 : vector<4x8x128xf32> to vector<32x128xf32>
    %c256 = arith.constant 256 : index
    %c0_20 = arith.constant 0 : index
    %36 = vector.load %arg3[%c256, %c0_20] : memref<1152x128xf32, #tpu.memory_space<vmem>>, vector<128x128xf32>
    %cst_21 = arith.constant dense<0.000000e+00> : vector<32x128xf32>
    %37 = tpu.matmul %35, %36, %cst_21 {dimension_numbers = #tpu.dot_dimension_numbers<[1], [0], [0], [1], [0, 0, 1, 1], [], []>} : vector<32x128xf32>, vector<128x128xf32>, vector<32x128xf32> -> vector<32x128xf32>
    %38 = arith.addf %33, %37 : vector<32x128xf32>
    %39 = vector.extract_strided_slice %24 {offsets = [1, 0, 0], sizes = [4, 8, 128], strides = [1, 1, 1]} : vector<6x10x128xf32> to vector<4x8x128xf32>
    %40 = vector.shape_cast %39 : vector<4x8x128xf32> to vector<32x128xf32>
    %c384 = arith.constant 384 : index
    %c0_22 = arith.constant 0 : index
    %41 = vector.load %arg3[%c384, %c0_22] : memref<1152x128xf32, #tpu.memory_space<vmem>>, vector<128x128xf32>
    %cst_23 = arith.constant dense<0.000000e+00> : vector<32x128xf32>
    %42 = tpu.matmul %40, %41, %cst_23 {dimension_numbers = #tpu.dot_dimension_numbers<[1], [0], [0], [1], [0, 0, 1, 1], [], []>} : vector<32x128xf32>, vector<128x128xf32>, vector<32x128xf32> -> vector<32x128xf32>
    %43 = arith.addf %38, %42 : vector<32x128xf32>
    %44 = vector.extract_strided_slice %24 {offsets = [1, 1, 0], sizes = [4, 8, 128], strides = [1, 1, 1]} : vector<6x10x128xf32> to vector<4x8x128xf32>
    %45 = vector.shape_cast %44 : vector<4x8x128xf32> to vector<32x128xf32>
    %c512 = arith.constant 512 : index
    %c0_24 = arith.constant 0 : index
    %46 = vector.load %arg3[%c512, %c0_24] : memref<1152x128xf32, #tpu.memory_space<vmem>>, vector<128x128xf32>
    %cst_25 = arith.constant dense<0.000000e+00> : vector<32x128xf32>
    %47 = tpu.matmul %45, %46, %cst_25 {dimension_numbers = #tpu.dot_dimension_numbers<[1], [0], [0], [1], [0, 0, 1, 1], [], []>} : vector<32x128xf32>, vector<128x128xf32>, vector<32x128xf32> -> vector<32x128xf32>
    %48 = arith.addf %43, %47 : vector<32x128xf32>
    %49 = vector.extract_strided_slice %24 {offsets = [1, 2, 0], sizes = [4, 8, 128], strides = [1, 1, 1]} : vector<6x10x128xf32> to vector<4x8x128xf32>
    %50 = vector.shape_cast %49 : vector<4x8x128xf32> to vector<32x128xf32>
    %c640 = arith.constant 640 : index
    %c0_26 = arith.constant 0 : index
    %51 = vector.load %arg3[%c640, %c0_26] : memref<1152x128xf32, #tpu.memory_space<vmem>>, vector<128x128xf32>
    %cst_27 = arith.constant dense<0.000000e+00> : vector<32x128xf32>
    %52 = tpu.matmul %50, %51, %cst_27 {dimension_numbers = #tpu.dot_dimension_numbers<[1], [0], [0], [1], [0, 0, 1, 1], [], []>} : vector<32x128xf32>, vector<128x128xf32>, vector<32x128xf32> -> vector<32x128xf32>
    %53 = arith.addf %48, %52 : vector<32x128xf32>
    %54 = vector.extract_strided_slice %24 {offsets = [2, 0, 0], sizes = [4, 8, 128], strides = [1, 1, 1]} : vector<6x10x128xf32> to vector<4x8x128xf32>
    %55 = vector.shape_cast %54 : vector<4x8x128xf32> to vector<32x128xf32>
    %c768 = arith.constant 768 : index
    %c0_28 = arith.constant 0 : index
    %56 = vector.load %arg3[%c768, %c0_28] : memref<1152x128xf32, #tpu.memory_space<vmem>>, vector<128x128xf32>
    %cst_29 = arith.constant dense<0.000000e+00> : vector<32x128xf32>
    %57 = tpu.matmul %55, %56, %cst_29 {dimension_numbers = #tpu.dot_dimension_numbers<[1], [0], [0], [1], [0, 0, 1, 1], [], []>} : vector<32x128xf32>, vector<128x128xf32>, vector<32x128xf32> -> vector<32x128xf32>
    %58 = arith.addf %53, %57 : vector<32x128xf32>
    %59 = vector.extract_strided_slice %24 {offsets = [2, 1, 0], sizes = [4, 8, 128], strides = [1, 1, 1]} : vector<6x10x128xf32> to vector<4x8x128xf32>
    %60 = vector.shape_cast %59 : vector<4x8x128xf32> to vector<32x128xf32>
    %c896 = arith.constant 896 : index
    %c0_30 = arith.constant 0 : index
    %61 = vector.load %arg3[%c896, %c0_30] : memref<1152x128xf32, #tpu.memory_space<vmem>>, vector<128x128xf32>
    %cst_31 = arith.constant dense<0.000000e+00> : vector<32x128xf32>
    %62 = tpu.matmul %60, %61, %cst_31 {dimension_numbers = #tpu.dot_dimension_numbers<[1], [0], [0], [1], [0, 0, 1, 1], [], []>} : vector<32x128xf32>, vector<128x128xf32>, vector<32x128xf32> -> vector<32x128xf32>
    %63 = arith.addf %58, %62 : vector<32x128xf32>
    %64 = vector.extract_strided_slice %24 {offsets = [2, 2, 0], sizes = [4, 8, 128], strides = [1, 1, 1]} : vector<6x10x128xf32> to vector<4x8x128xf32>
    %65 = vector.shape_cast %64 : vector<4x8x128xf32> to vector<32x128xf32>
    %c1024 = arith.constant 1024 : index
    %c0_32 = arith.constant 0 : index
    %66 = vector.load %arg3[%c1024, %c0_32] : memref<1152x128xf32, #tpu.memory_space<vmem>>, vector<128x128xf32>
    %cst_33 = arith.constant dense<0.000000e+00> : vector<32x128xf32>
    %67 = tpu.matmul %65, %66, %cst_33 {dimension_numbers = #tpu.dot_dimension_numbers<[1], [0], [0], [1], [0, 0, 1, 1], [], []>} : vector<32x128xf32>, vector<128x128xf32>, vector<32x128xf32> -> vector<32x128xf32>
    %68 = arith.addf %63, %67 : vector<32x128xf32>
    %c0_34 = arith.constant 0 : index
    %c0_35 = arith.constant 0 : index
    %69 = vector.load %arg4[%c0_34, %c0_35] : memref<1x128xf32, #tpu.memory_space<vmem>>, vector<1x128xf32>
    %70 = vector.broadcast %69 : vector<1x128xf32> to vector<32x128xf32>
    %71 = arith.addf %68, %70 : vector<32x128xf32>
    %72 = vector.shape_cast %71 : vector<32x128xf32> to vector<1x4x8x128xf32>
    %c0_36 = arith.constant 0 : index
    %c0_37 = arith.constant 0 : index
    %c0_38 = arith.constant 0 : index
    %c0_39 = arith.constant 0 : index
    %73 = vector.load %arg5[%c0_36, %c0_37, %c0_38, %c0_39] : memref<1x4x8x128xf32, #tpu.memory_space<vmem>>, vector<1x4x8x128xf32>
    tpu.vector_store %arg5[%c0_36, %c0_37, %c0_38, %c0_39], %72 {strides = array<i32>} : memref<1x4x8x128xf32, #tpu.memory_space<vmem>>, vector<1x4x8x128xf32>,
    return
  }
  func.func @transform_1(%arg0: i32, %arg1: i32) -> (i32, i32) {
    %c0_i32 = arith.constant 0 : i32
    %c0_i32_0 = arith.constant 0 : i32
    %c0_i32_1 = arith.constant 0 : i32
    return %c0_i32, %c0_i32_0 : i32, i32
  }
  func.func @transform_2(%arg0: i32, %arg1: i32) -> (i32, i32) {
    %c0_i32 = arith.constant 0 : i32
    %c0_i32_0 = arith.constant 0 : i32
    %c0_i32_1 = arith.constant 0 : i32
    return %c0_i32, %c0_i32_0 : i32, i32
  }
  func.func @transform_3(%arg0: i32, %arg1: i32) -> (i32, i32, i32, i32) {
    %c0_i32 = arith.constant 0 : i32
    %c0_i32_0 = arith.constant 0 : i32
    %c0_i32_1 = arith.constant 0 : i32
    return %arg0, %arg1, %c0_i32, %c0_i32_0 : i32, i32, i32, i32
  }
}

</mosaic_0001>

<bundles_post_ra>
// kernel: stem_forward.2
= control target key start
LH: loop header
LB: loop body
LE: loop exit
PB: predicated region body
PF: predicated region fallthrough
CT: control target
= control target key end

     0   :  { %s772_s18 = smov 0   ;;  %s774_s19 = smov 0   ;;  %s869_s0 = inlined_call_operand.vmem [shape: f32[2,8,8,36], index: 0, kind: input, shape index: {}]   ;;  %s870_s1 = inlined_call_operand.vmem [shape: f32[36,128], index: 1, kind: input, shape index: {}]   ;;  %s871_s2 = inlined_call_operand.vmem [shape: f32[1,128], index: 2, kind: input, shape index: {}]   ;;  %s872_s3 = inlined_call_operand.vmem [shape: f32[1,128], index: 3, kind: input, shape index: {}]   ;;  %s873_s4 = inlined_call_operand.vmem [shape: f32[1,128], index: 4, kind: input, shape index: {}]   ;;  %s874_s5 = inlined_call_operand.vmem [shape: f32[2,8,8,128], index: 5, kind: output, shape index: {}]  }
   0x1   :  { %s776_s20 = smov 0   ;;  %s778_s21 = smov 0  }
   0x2   :  { %s780_s22 = smov 0  }
   0x3 LB: > { %s24_s23 = sadd.s32 1, %s732_s20  ;;  %s27_s24 = sadd.s32 1, %s736_s21  ;;  %s740_s22 = sphi %s780_s22, %s15_s22   ;;  %s736_s21 = sphi %s778_s21, %s878_s21   ;;  %s732_s20 = sphi %s776_s20, %s877_s20   ;;  %s728_s19 = sphi %s774_s19, %s876_s19   ;;  %s724_s18 = sphi %s772_s18, %s875_s18  }
   0x4   : > { %p25_p0 = scmp.ge.s32.totalorder %s24_s23, 2  ;;  %p594_p1 = scmp.ge.s32.totalorder %s740_s22, 1 }
   0x5   : > { %p208_p2 = scmp.lt.s32.totalorder %s740_s22, 5 }
   0x6   : > { %s880_s23 = smov (%p25_p0, %s24_s23), 0  ;;  %s882_s24 = smov (!%p25_p0, %s27_s24), %s736_s21 }
   0x7   : > { %p209_p3 = pnand %p594_p1, %p208_p2  ;;  %p29_p4 = scmp.ge.s32.totalorder %s882_s24, 2 }
   0x8   : > { %s595_s29 = sshll.u32 (!%p209_p3), %s724_s18, 2  ;;  %p245_p5 = scmp.lt.s32.totalorder (!%p209_p3), %s728_s19, 1 }
   0x9   : > { %s884_s24 = smov (%p29_p4, %s882_s24), 0  ;;  %212 = sbr.rel (%p209_p3) target bundleno = 429 (0x1ad), region = 40 }
   0xa   : > { %p247_p6 = scmp.lt.s32.totalorder (!%p209_p3), %s595_s29, 7 }
   0xe   : > { %v272_v0 = vld [vmem:[%s870_s1 + $0x20] sm:$0xf]  ;;  %vm293_vm0 = vcmask 1043456   ;;  %v271_v1 = vld [vmem:[%s870_s1 + $0x18] sm:$0xff]  ;;  %v270_v2 = vld [vmem:[%s870_s1 + $0x10] sm:$0xff]  ;;  %s886_s19 = smov (!%p245_p5, %s728_s19), 1 }
   0xf   : > { %620 = vmatprep.subr.msk.mxu0 %vm293_vm0, %v272_v0  ;;  %636 = vmatprep.subr.msk.mxu1 %vm293_vm0, %v272_v0  ;;  %v269_v3 = vld [vmem:[%s870_s1 + $0x8] sm:$0xff]  ;;  %s888_s29 = smov (!%p247_p6, %s595_s29), 7  ;;  %s596_s9 = sshll.u32 %s886_s19, 3  ;;  %v268_v4 = vld [vmem:[%s870_s1] sm:$0xff]  ;;  %vm280_vm1 = vcmask 293888  }
  0x10   : > { %621 = vmatpush3.msk.msra.mxu0 %vm293_vm0, %v272_v0  ;;  %641 = vmatpush3.msk.msra.mxu1 %vm293_vm0, %v272_v0  ;;  %s820_s12 = sadd.s32 %s596_s9, %s888_s29  ;;  %v601_v9 = vld [vmem:[%s871_s2] ss:$0 sm:$0xff] }
  0x11   : > { %622 = vmatprep.subr.mxu0 %v271_v1  ;;  %637 = vmatprep.subr.mxu1 %v271_v1  ;;  %s597_s13 = sshll.u32 %s820_s12, 3  ;;  %v607_v57 = vld [vmem:[%s872_s3] ss:$0 sm:$0xff] }
  0x12   : > { %623 = vmatpush3.msra.mxu0 %v271_v1  ;;  %642 = vmatpush3.msra.mxu1 %v271_v1  ;;  %s252_s16 = scalar_lea.vmem %s869_s0, %s597_s13  ;;  %v608_v60 = vld [vmem:[%s873_s4] ss:$0 sm:$0xff]  ;;  %s262_s30 = scalar_lea.vmem %s874_s5, %s597_s13 }
  0x13   : > { %624 = vmatprep.subr.mxu0 %v270_v2  ;;  %638 = vmatprep.subr.mxu1 %v270_v2  ;;  %v264_v5 = vld [vmem:[%s252_s16] sm:$0xff]  ;;  %v266_v6 = vld [vmem:[%s252_s16 + $0x10] sm:$0xff]  ;;  %v265_v7 = vld [vmem:[%s252_s16 + $0x8] sm:$0xff] }
  0x14   : > { %625 = vmatpush3.msra.mxu0 %v270_v2  ;;  %643 = vmatpush3.msra.mxu1 %v270_v2  ;;  %v267_v8 = vld [vmem:[%s252_s16 + $0x18] sm:$0xff] }
  0x15   : > { %626 = vmatprep.subr.mxu0 %v269_v3  ;;  %639 = vmatprep.subr.mxu1 %v269_v3 }
  0x16   : > { %627 = vmatpush3.msra.mxu0 %v269_v3  ;;  %644 = vmatpush3.msra.mxu1 %v269_v3 }
  0x17   : > { %628 = vmatprep.subr.mxu0 %v268_v4  ;;  %640 = vmatprep.subr.mxu1 %v268_v4 }
  0x18   : > { %629 = vmatpush3.msra.mxu0 %v268_v4  ;;  %645 = vmatpush3.msra.mxu1 %v268_v4 }
  0x19   : > { %630 = vmatprep.mubr.msk.f32.mxu0 %vm280_vm1, %v264_v5  ;;  %633 = vmatprep.mubr.msk.f32.mxu1 %vm280_vm1, %v266_v6 }
  0x1a   : > { %631 = vmatmul.mubr.msk.f32.vlgmr.msra.gmra.mxu0 %vm280_vm1, %v265_v7  ;;  %634 = vmatmul.mubr.msk.f32.vlgmr.msra.gmra.mxu1 %vm280_vm1, %v267_v8 }
  0xda   : > { %v632_v10 = vpop.f32.mrf.mxu0  ;;  %v635_v11 = vpop.f32.mrf.mxu1 }
  0xdb   : > { %v369_v12 = vadd.f32 %v632_v10, %v601_v9  ;;  %v831_v13 = vadd.f32 %v635_v11, %v601_v9 }
  0xdc   : > { %v363_v14 = vpop.f32.mrf.mxu0  ;;  %v373_v15 = vpop.f32.mrf.mxu1 }
  0xdd   : > { %388 = vadd.xlane.f32.xlu1 %v831_v13  ;;  %384 = vadd.xlane.f32.xlu0 %v369_v12  ;;  %v364_v16 = vadd.f32 %v601_v9, %v363_v14  ;;  %v834_v17 = vadd.f32 %v601_v9, %v373_v15  ;;  %v395_v18 = vmul.f32 %v369_v12, %v369_v12 }
  0xde   : > { %v397_v20 = vmul.f32 %v831_v13, %v831_v13 }
  0xdf   : > { %v394_v19 = vmul.f32 %v364_v16, %v364_v16  ;;  %v396_v21 = vmul.f32 %v834_v17, %v834_v17 }
  0xe1   : > { %386 = vadd.xlane.f32.xlu1 %v834_v17  ;;  %382 = vadd.xlane.f32.xlu0 %v364_v16 }
  0xe5   : > { %400 = vadd.xlane.f32.xlu1 %v395_v18  ;;  %398 = vadd.xlane.f32.xlu0 %v394_v19 }
  0xe9   : > { %404 = vadd.xlane.f32.xlu1 %v397_v20  ;;  %402 = vadd.xlane.f32.xlu0 %v396_v21 }
 0x166   : > { %v389_v22 = vpop.xlane.xlu1 %388  ;;  %v385_v23 = vpop.xlane.xlu0 %384 }
 0x167   : > { %v391_v26 = vmul.f32 0.03125, %v385_v23  ;;  %v393_v28 = vmul.f32 0.03125, %v389_v22 }
 0x169   : > { %v411_v32 = vmul.f32 %v391_v26, %v391_v26  ;;  %v413_v38 = vmul.f32 %v393_v28, %v393_v28  ;;  %v431_v54 = vsub.f32 %v369_v12, %v391_v26  ;;  %v433_v62 = vsub.f32 %v831_v13, %v393_v28 }
 0x16a   : > { %v387_v24 = vpop.xlane.xlu1 %386  ;;  %v383_v25 = vpop.xlane.xlu0 %382 }
 0x16b   : > { %v390_v27 = vmul.f32 0.03125, %v383_v25  ;;  %v392_v29 = vmul.f32 0.03125, %v387_v24 }
 0x16d   : > { %v410_v33 = vmul.f32 %v390_v27, %v390_v27  ;;  %v412_v39 = vmul.f32 %v392_v29, %v392_v29  ;;  %v430_v56 = vsub.f32 %v364_v16, %v390_v27  ;;  %v432_v1 = vsub.f32 %v834_v17, %v392_v29 }
 0x16e   : > { %v401_v30 = vpop.xlane.xlu1 %400  ;;  %v399_v31 = vpop.xlane.xlu0 %398 }
 0x16f   : > { %v407_v34 = vmul.f32 0.03125, %v401_v30  ;;  %v406_v35 = vmul.f32 0.03125, %v399_v31 }
 0x171   : > { %v415_v36 = vsub.f32 %v407_v34, %v411_v32  ;;  %v414_v37 = vsub.f32 %v406_v35, %v410_v33 }
 0x172   : > { %v405_v40 = vpop.xlane.xlu1 %404  ;;  %v403_v41 = vpop.xlane.xlu0 %402 }
 0x173   : > { %v419_v42 = vmax.f32 %v415_v36, 0.0  ;;  %v418_v43 = vmax.f32 %v414_v37, 0.0  ;;  %v409_v44 = vmul.f32 0.03125, %v405_v40  ;;  %v408_v45 = vmul.f32 0.03125, %v403_v41 }
 0x175   : > { %v423_v46 = vadd.f32 1e-06, %v419_v42  ;;  %v422_v47 = vadd.f32 1e-06, %v418_v43  ;;  %v417_v48 = vsub.f32 %v409_v44, %v413_v38  ;;  %v416_v49 = vsub.f32 %v408_v45, %v412_v39 }
 0x177   : > { %686 = vrsqrt.f32 %v423_v46  ;;  %v421_v50 = vmax.f32 %v417_v48, 0.0  ;;  %v420_v51 = vmax.f32 %v416_v49, 0.0 }
 0x178   : > { %688 = vrsqrt.f32 %v422_v47 }
 0x179   : > { %v425_v52 = vadd.f32 1e-06, %v421_v50  ;;  %v424_v53 = vadd.f32 1e-06, %v420_v51 }
 0x17b   : > { %690 = vrsqrt.f32 %v425_v52 }
 0x17c   : > { %692 = vrsqrt.f32 %v424_v53 }
 0x184   : > { %v687_v55 = vpop.eup %686 }
 0x185   : > { %v689_v58 = vpop.eup %688  ;;  %v435_v59 = vmul.f32 %v687_v55, %v431_v54 }
 0x186   : > { %v434_v61 = vmul.f32 %v689_v58, %v430_v56 }
 0x187   : > { %v446_v63 = vmul.f32 %v607_v57, %v435_v59 }
 0x188   : > { %v691_v0 = vpop.eup %690  ;;  %v445_v2 = vmul.f32 %v607_v57, %v434_v61 }
 0x189   : > { %v693_v3 = vpop.eup %692  ;;  %v457_v4 = vadd.f32 %v608_v60, %v446_v63  ;;  %v437_v5 = vmul.f32 %v691_v0, %v433_v62 }
 0x18a   : > { %v456_v6 = vadd.f32 %v608_v60, %v445_v2  ;;  %v436_v7 = vmul.f32 %v693_v3, %v432_v1 }
 0x18b   : > { %v465_v8 = vmul.f32 0.044715, %v457_v4  ;;  %v448_v9 = vmul.f32 %v607_v57, %v437_v5  ;;  %v461_v34 = vmul.f32 0.5, %v457_v4 }
 0x18c   : > { %v464_v10 = vmul.f32 0.044715, %v456_v6  ;;  %v447_v11 = vmul.f32 %v607_v57, %v436_v7  ;;  %v460_v36 = vmul.f32 0.5, %v456_v6 }
 0x18d   : > { %v469_v12 = vmul.f32 %v465_v8, %v457_v4  ;;  %v459_v14 = vadd.f32 %v608_v60, %v448_v9 }
 0x18e   : > { %v468_v15 = vmul.f32 %v464_v10, %v456_v6  ;;  %v458_v16 = vadd.f32 %v608_v60, %v447_v11 }
 0x18f   : > { %v473_v18 = vmul.f32 %v469_v12, %v457_v4  ;;  %v467_v13 = vmul.f32 0.044715, %v459_v14  ;;  %v463_v42 = vmul.f32 0.5, %v459_v14 }
 0x190   : > { %v472_v19 = vmul.f32 %v468_v15, %v456_v6  ;;  %v466_v20 = vmul.f32 0.044715, %v458_v16  ;;  %v462_v44 = vmul.f32 0.5, %v458_v16 }
 0x191   : > { %v477_v21 = vadd.f32 %v473_v18, %v457_v4  ;;  %v471_v17 = vmul.f32 %v467_v13, %v459_v14 }
 0x192   : > { %v476_v22 = vadd.f32 %v472_v19, %v456_v6  ;;  %v470_v23 = vmul.f32 %v466_v20, %v458_v16 }
 0x193   : > { %v481_v24 = vmul.f32 0.7978846, %v477_v21  ;;  %v475_v25 = vmul.f32 %v471_v17, %v459_v14 }
 0x194   : > { %v480_v26 = vmul.f32 0.7978846, %v476_v22  ;;  %v474_v27 = vmul.f32 %v470_v23, %v458_v16 }
 0x195   : > { %694 = vtanh.f32 %v481_v24  ;;  %v479_v28 = vadd.f32 %v475_v25, %v459_v14 }
 0x196   : > { %696 = vtanh.f32 %v480_v26  ;;  %v478_v29 = vadd.f32 %v474_v27, %v458_v16 }
 0x197   : > { %v483_v30 = vmul.f32 0.7978846, %v479_v28 }
 0x198   : > { %v482_v31 = vmul.f32 0.7978846, %v478_v29 }
 0x199   : > { %698 = vtanh.f32 %v483_v30 }
 0x19a   : > { %700 = vtanh.f32 %v482_v31 }
 0x1a2   : > { %v695_v32 = vpop.eup %694 }
 0x1a3   : > { %v697_v33 = vpop.eup %696  ;;  %v489_v35 = vadd.f32 1.0, %v695_v32 }
 0x1a4   : > { %v488_v37 = vadd.f32 1.0, %v697_v33 }
 0x1a5   : > { %v493_v38 = vmul.f32 %v489_v35, %v461_v34 }
 0x1a6   : > { %v699_v39 = vpop.eup %698  ;;  %v492_v40 = vmul.f32 %v488_v37, %v460_v36 }
 0x1a7   : > { %v701_v41 = vpop.eup %700  ;;  %497 = vst [vmem:[%s262_s30 + $0x8] sm:$0xff] %v493_v38  ;;  %v491_v43 = vadd.f32 1.0, %v699_v39 }
 0x1a8   : > { %496 = vst [vmem:[%s262_s30] sm:$0xff] %v492_v40  ;;  %v490_v45 = vadd.f32 1.0, %v701_v41 }
 0x1a9   : > { %v495_v46 = vmul.f32 %v491_v43, %v463_v42 }
 0x1aa   : > { %v494_v47 = vmul.f32 %v490_v45, %v462_v44 }
 0x1ab   : > { %499 = vst [vmem:[%s262_s30 + $0x18] sm:$0xff] %v495_v46 }
 0x1ac   : > { %498 = vst [vmem:[%s262_s30 + $0x10] sm:$0xff] %v494_v47 }
 0x1ad PF: > { %s15_s22 = sadd.s32 1, %s740_s22   ;;  %s875_s18 = smov %s732_s20 }
 0x1ae   : > { %p12_p7 = scmp.ge.s32.totalorder %s15_s22, 6   ;;  %s876_s19 = smov %s736_s21 }
 0x1af   : > { %s877_s20 = smov %s880_s23  ;;  %s878_s21 = smov %s884_s24 }
 0x1b0   :  { %14 = sbr.rel (!%p12_p7) target bundleno = 3 (0x3), region = 70 }

// kernel: stem_forward.3
= control target key start
LH: loop header
LB: loop body
LE: loop exit
PB: predicated region body
PF: predicated region fallthrough
CT: control target
= control target key end

     0   :  { %s2221_s12 = smov 0   ;;  %s2223_s13 = smov 0   ;;  %s2862_s0 = inlined_call_operand.vmem [shape: f32[20,10,128], index: 0, kind: input, shape index: {}]   ;;  %s2863_s1 = inlined_call_operand.vmem [shape: f32[1152,128], index: 1, kind: input, shape index: {}]   ;;  %s2864_s2 = inlined_call_operand.vmem [shape: f32[1,128], index: 2, kind: input, shape index: {}]   ;;  %s2865_s3 = inlined_call_operand.vmem [shape: f32[2,8,8,128], index: 3, kind: output, shape index: {}]  }
   0x1   :  { %s2225_s14 = smov 0   ;;  %s2227_s15 = smov 0  }
   0x2   :  { %s2229_s16 = smov 0  }
   0x3 LB: > { %s22_s17 = sadd.s32 1, %s2191_s14  ;;  %s25_s18 = sadd.s32 1, %s2195_s15  ;;  %s2199_s16 = sphi %s2229_s16, %s13_s16   ;;  %s2195_s15 = sphi %s2227_s15, %s2869_s15   ;;  %s2191_s14 = sphi %s2225_s14, %s2868_s14   ;;  %s2187_s13 = sphi %s2223_s13, %s2867_s13   ;;  %s2183_s12 = sphi %s2221_s12, %s2866_s12  }
   0x4   : > { %p23_p0 = scmp.ge.s32.totalorder %s22_s17, 2  ;;  %p1517_p1 = scmp.ge.s32.totalorder %s2199_s16, 1 }
   0x5   : > { %p117_p2 = scmp.lt.s32.totalorder %s2199_s16, 5 }
   0x6   : > { %s2871_s17 = smov (%p23_p0, %s22_s17), 0  ;;  %s2873_s18 = smov (!%p23_p0, %s25_s18), %s2195_s15 }
   0x7   : > { %p118_p3 = pnand %p1517_p1, %p117_p2  ;;  %p27_p4 = scmp.ge.s32.totalorder %s2873_s18, 2 }
   0x8   : > { %s2256_s19 = sshll.u32 (!%p118_p3), %s2183_s12, 2  ;;  %p139_p5 = scmp.lt.s32.totalorder (!%p118_p3), %s2187_s13, 1 }
   0x9   : > { %s2875_s18 = smov (%p27_p4, %s2873_s18), 0  ;;  %121 = sbr.rel (%p118_p3) target bundleno = 438 (0x1b6), region = 28 }
   0xa   : > { %p141_p6 = scmp.lt.s32.totalorder (!%p118_p3), %s2256_s19, 7  ;;  %p1521_p7 = scmp.ne.s32.totalorder (!%p118_p3), %s2183_s12, 0 }
   0xe   : > { %s140_s20 = scalar_select %p139_p5, %s2187_s13, 1 }
   0xf   : > { %s142_s21 = scalar_select %p141_p6, %s2256_s19, 7 }
  0x10   : > { %s1519_s22 = sshll.u32 %s140_s20, 3  ;;  %151 = sbr.rel (%p1521_p7) target bundleno = 30 (0x1e), region = 32 }
  0x11   : > { %s144_s23 = sadd.s32 %s1519_s22, %s142_s21  ;;  %s1522_s28 = smul.u32 (!%p1521_p7), 160, %s2187_s13 }
  0x12   : > { %s1520_s24 = sshll.u32 %s144_s23, 3 }
  0x13   : > { %s2265_s27 = scalar_lea.vmem %s2865_s3, %s1520_s24  ;;  %s154_s4 = scalar_lea.vmem (!%p1521_p7), %s2862_s0, %s1522_s28 }
  0x15   : > { %v203_v0 = vld [vmem:[%s154_s4] sm:$0xff]  ;;  %v205_v1 = vld [vmem:[%s154_s4 + $0x10] sm:$0xff]  ;;  %v1523_v6 = vld [vmem:[%s154_s4 + $0x8] sm:$0x3] }
  0x16   : > { %v207_v2 = vld [vmem:[%s154_s4 + $0x20] sm:$0xff]  ;;  %204 = vst [vmem:[#allocation2] sm:$0xff] %v203_v0  ;;  %206 = vst [vmem:[#allocation2 + $0x10] sm:$0xff] %v205_v1  ;;  %v209_v3 = vld [vmem:[%s154_s4 + $0x30] sm:$0xff] }
  0x17   : > { %208 = vst [vmem:[#allocation2 + $0x20] sm:$0xff] %v207_v2  ;;  %v211_v4 = vld [vmem:[%s154_s4 + $0x40] sm:$0xff]  ;;  %v213_v5 = vld [vmem:[%s154_s4 + $0x50] sm:$0xff]  ;;  %210 = vst [vmem:[#allocation2 + $0x30] sm:$0xff] %v209_v3 }
  0x18   : > { %212 = vst [vmem:[#allocation2 + $0x40] sm:$0xff] %v211_v4  ;;  %214 = vst [vmem:[#allocation2 + $0x50] sm:$0xff] %v213_v5  ;;  %v1524_v7 = vld [vmem:[%s154_s4 + $0x18] sm:$0x3]  ;;  %v1525_v8 = vld [vmem:[%s154_s4 + $0x28] sm:$0x3] }
  0x19   : > { %226 = vst [vmem:[#allocation2 + $0x8] sm:$0x3] %v1523_v6  ;;  %228 = vst [vmem:[#allocation2 + $0x18] sm:$0x3] %v1524_v7  ;;  %v1526_v9 = vld [vmem:[%s154_s4 + $0x38] sm:$0x3] }
  0x1a   : > { %230 = vst [vmem:[#allocation2 + $0x28] sm:$0x3] %v1525_v8  ;;  %v1527_v10 = vld [vmem:[%s154_s4 + $0x48] sm:$0x3]  ;;  %v1528_v11 = vld [vmem:[%s154_s4 + $0x58] sm:$0x3] }
  0x1b   : > { %232 = vst [vmem:[#allocation2 + $0x38] sm:$0x3] %v1526_v9  ;;  %234 = vst [vmem:[#allocation2 + $0x48] sm:$0x3] %v1527_v10 }
  0x1c   : > { %236 = vst [vmem:[#allocation2 + $0x58] sm:$0x3] %v1528_v11 }
  0x1d   : > { %240 = vsyncadd [#allocation3], 960 }
  0x1e PF: > { %p241_p8 = scmp.lt.s32.totalorder %s2183_s12, 0  ;;  %s242_s5 = ssub.s32 0, %s2183_s12 }
  0x1f   : > { %s1529_s6 = smin.u32 %s2183_s12, %s242_s5 }
  0x20   : > { %s244_s7 = sand.u32 1, %s1529_s6  }
  0x21   : > { %s245_s8 = ssub.s32 0, %s244_s7 }
  0x22   : > { %s2877_s8 = smov (!%p241_p8, %s245_s8), %s244_s7 }
  0x23   : > { %p1531_p9 = scmp.lt.s32.totalorder %s2877_s8, 0  ;;  %s251_s9 = sadd.s32 2, %s2877_s8 }
  0x25   : > { %s2879_s9 = smov (!%p1531_p9, %s251_s9), %s2877_s8 }
  0x26   : > { %s253_s10 = smul.u32 96, %s2879_s9  ;;  %s255_s20 = scalar_lea.sflag [#allocation3], %s2879_s9 }
  0x28   : > { %s2278_s11 = scalar_lea.vmem [#allocation2], %s253_s10 }
  0x29   : > { %2179 = dma.done.wait %s255_s20, 960 }
  0x2a   : > { %2180 = vsyncadd %s255_s20, 4294966336  ;;  %s260_s21 = sadd.s32 1, %s2183_s12 }
  0x2b   : > { %p1532_p10 = scmp.ge.s32.totalorder %s260_s21, 2 }
  0x2c   : > { %s265_s22 = ssub.s32 (!%p1532_p10), 1, %s2879_s9  ;;  %s1444_s23 = smul.u32 (!%p1532_p10), 10, %s2187_s13 }
  0x2d   : > { %264 = sbr.rel (%p1532_p10) target bundleno = 59 (0x3b), region = 73  ;;  %s273_s13 = scalar_lea.sflag (!%p1532_p10), [#allocation3], %s265_s22 }
  0x2e   : > { %s271_s24 = smul.u32 (!%p1532_p10), 96, %s265_s22  ;;  %s1446_s25 = sadd.s32 (!%p1532_p10), %s2256_s19, %s1444_s23 }
  0x2f   : > { %s1534_s26 = sshll.u32 (!%p1532_p10), %s1446_s25, 4 }
  0x30   : > { %s1448_s30 = scalar_lea.vmem (!%p1532_p10), %s2862_s0, %s1534_s26  ;;  %s272_s12 = scalar_lea.vmem (!%p1532_p10), [#allocation2], %s271_s24 }
  0x32   : > { %v1536_v12 = vld [vmem:[%s1448_s30 + $0x40] sm:$0xff]  ;;  %v1537_v13 = vld [vmem:[%s1448_s30 + $0x50] sm:$0xff]  ;;  %v1542_v18 = vld [vmem:[%s1448_s30 + $0x48] sm:$0x3] }
  0x33   : > { %v1538_v14 = vld [vmem:[%s1448_s30 + $0x60] sm:$0xff]  ;;  %323 = vst [vmem:[%s272_s12] sm:$0xff] %v1536_v12  ;;  %325 = vst [vmem:[%s272_s12 + $0x10] sm:$0xff] %v1537_v13  ;;  %v1539_v15 = vld [vmem:[%s1448_s30 + $0x70] sm:$0xff] }
  0x34   : > { %327 = vst [vmem:[%s272_s12 + $0x20] sm:$0xff] %v1538_v14  ;;  %v1540_v16 = vld [vmem:[%s1448_s30 + $0x80] sm:$0xff]  ;;  %v1541_v17 = vld [vmem:[%s1448_s30 + $0x90] sm:$0xff]  ;;  %329 = vst [vmem:[%s272_s12 + $0x30] sm:$0xff] %v1539_v15 }
  0x35   : > { %331 = vst [vmem:[%s272_s12 + $0x40] sm:$0xff] %v1540_v16  ;;  %333 = vst [vmem:[%s272_s12 + $0x50] sm:$0xff] %v1541_v17  ;;  %v1544_v19 = vld [vmem:[%s1448_s30 + $0x58] sm:$0x3]  ;;  %v1546_v20 = vld [vmem:[%s1448_s30 + $0x68] sm:$0x3] }
  0x36   : > { %1543 = vst [vmem:[%s272_s12 + $0x8] sm:$0x3] %v1542_v18  ;;  %1545 = vst [vmem:[%s272_s12 + $0x18] sm:$0x3] %v1544_v19  ;;  %v1548_v21 = vld [vmem:[%s1448_s30 + $0x78] sm:$0x3] }
  0x37   : > { %1547 = vst [vmem:[%s272_s12 + $0x28] sm:$0x3] %v1546_v20  ;;  %v1550_v22 = vld [vmem:[%s1448_s30 + $0x88] sm:$0x3]  ;;  %v1552_v23 = vld [vmem:[%s1448_s30 + $0x98] sm:$0x3] }
  0x38   : > { %1549 = vst [vmem:[%s272_s12 + $0x38] sm:$0x3] %v1548_v21  ;;  %1551 = vst [vmem:[%s272_s12 + $0x48] sm:$0x3] %v1550_v22 }
  0x39   : > { %1553 = vst [vmem:[%s272_s12 + $0x58] sm:$0x3] %v1552_v23 }
  0x3a   : > { %359 = vsyncadd %s273_s13, 960 }
  0x3b PF: > { %v428_v24 = vld [vmem:[%s2863_s1 + $0xf8] sm:$0xff]  ;;  %v427_v26 = vld [vmem:[%s2863_s1 + $0xf0] sm:$0xff]  ;;  %v426_v28 = vld [vmem:[%s2863_s1 + $0xe8] sm:$0xff]  ;;  %vm396_vm0 = vcmask 1046528   ;;  %vm599_vm1 = vcmask 1045504  }
  0x3c   : > { %v387_v25 = vld [vmem:[%s2863_s1 + $0x78] sm:$0xff]  ;;  %1745 = vmatprep.subr.mxu0 %v428_v24  ;;  %v386_v27 = vld [vmem:[%s2863_s1 + $0x70] sm:$0xff]  ;;  %v385_v29 = vld [vmem:[%s2863_s1 + $0x68] sm:$0xff] }
  0x3d   : > { %1783 = vmatprep.subr.mxu1 %v387_v25  ;;  %1746 = vmatpush3.msra.mxu0 %v428_v24  ;;  %v425_v30 = vld [vmem:[%s2863_s1 + $0xe0] sm:$0xff]  ;;  %v424_v32 = vld [vmem:[%s2863_s1 + $0xd8] sm:$0xff]  ;;  %v423_v34 = vld [vmem:[%s2863_s1 + $0xd0] sm:$0xff] }
  0x3e   : > { %1784 = vmatpush3.msra.mxu1 %v387_v25  ;;  %1747 = vmatprep.subr.mxu0 %v427_v26  ;;  %v384_v31 = vld [vmem:[%s2863_s1 + $0x60] sm:$0xff]  ;;  %v383_v33 = vld [vmem:[%s2863_s1 + $0x58] sm:$0xff]  ;;  %v382_v35 = vld [vmem:[%s2863_s1 + $0x50] sm:$0xff] }
  0x3f   : > { %1785 = vmatprep.subr.mxu1 %v386_v27  ;;  %1748 = vmatpush3.msra.mxu0 %v427_v26  ;;  %v422_v36 = vld [vmem:[%s2863_s1 + $0xc8] sm:$0xff]  ;;  %v421_v38 = vld [vmem:[%s2863_s1 + $0xc0] sm:$0xff]  ;;  %v420_v40 = vld [vmem:[%s2863_s1 + $0xb8] sm:$0xff] }
  0x40   : > { %1786 = vmatpush3.msra.mxu1 %v386_v27  ;;  %1749 = vmatprep.subr.mxu0 %v426_v28  ;;  %v381_v37 = vld [vmem:[%s2863_s1 + $0x48] sm:$0xff]  ;;  %v380_v39 = vld [vmem:[%s2863_s1 + $0x40] sm:$0xff]  ;;  %v379_v41 = vld [vmem:[%s2863_s1 + $0x38] sm:$0xff] }
  0x41   : > { %1787 = vmatprep.subr.mxu1 %v385_v29  ;;  %1750 = vmatpush3.msra.mxu0 %v426_v28  ;;  %v419_v42 = vld [vmem:[%s2863_s1 + $0xb0] sm:$0xff]  ;;  %v418_v44 = vld [vmem:[%s2863_s1 + $0xa8] sm:$0xff]  ;;  %v417_v46 = vld [vmem:[%s2863_s1 + $0xa0] sm:$0xff] }
  0x42   : > { %1788 = vmatpush3.msra.mxu1 %v385_v29  ;;  %1751 = vmatprep.subr.mxu0 %v425_v30  ;;  %v378_v43 = vld [vmem:[%s2863_s1 + $0x30] sm:$0xff]  ;;  %v377_v45 = vld [vmem:[%s2863_s1 + $0x28] sm:$0xff]  ;;  %v376_v47 = vld [vmem:[%s2863_s1 + $0x20] sm:$0xff] }
  0x43   : > { %1789 = vmatprep.subr.mxu1 %v384_v31  ;;  %1752 = vmatpush3.msra.mxu0 %v425_v30  ;;  %v416_v48 = vld [vmem:[%s2863_s1 + $0x98] sm:$0xff]  ;;  %v2371_v50 = vld [vmem:[%s2278_s11] sm:$0xff]  ;;  %v2374_v51 = vld [vmem:[%s2278_s11 + $0x8] sm:$0x3] }
  0x44   : > { %1790 = vmatpush3.msra.mxu1 %v384_v31  ;;  %1753 = vmatprep.subr.mxu0 %v424_v32  ;;  %v375_v49 = vld [vmem:[%s2863_s1 + $0x18] sm:$0xff]  ;;  %v415_v52 = vld [vmem:[%s2863_s1 + $0x90] sm:$0xff]  ;;  %v397_v56 = vrot.slane %v2371_v50, 1  ;;  %v398_v57 = vrot.slane %v2374_v51, 1  ;;  %v414_v58 = vld [vmem:[%s2863_s1 + $0x88] sm:$0xff] }
  0x45   : > { %1791 = vmatprep.subr.mxu1 %v383_v33  ;;  %1754 = vmatpush3.msra.mxu0 %v424_v32  ;;  %v374_v53 = vld [vmem:[%s2863_s1 + $0x10] sm:$0xff]  ;;  %v2386_v55 = vld [vmem:[%s2278_s11 + $0x18] sm:$0x3]  ;;  %v373_v59 = vld [vmem:[%s2863_s1 + $0x8] sm:$0xff] }
  0x46   : > { %1792 = vmatpush3.msra.mxu1 %v383_v33  ;;  %1755 = vmatprep.subr.mxu0 %v423_v34  ;;  %v2383_v54 = vld [vmem:[%s2278_s11 + $0x10] sm:$0xff]  ;;  %v401_v61 = vrot.slane %v2386_v55, 1  ;;  %v413_v62 = vld [vmem:[%s2863_s1 + $0x80] sm:$0xff]  ;;  %v399_v0 = vsel %vm396_vm0, %v397_v56, %v398_v57  ;;  %v631_v2 = vld [vmem:[%s2863_s1 + $0x178] sm:$0xff] }
  0x47   : > { %1793 = vmatprep.subr.mxu1 %v382_v35  ;;  %1756 = vmatpush3.msra.mxu0 %v423_v34  ;;  %v400_v60 = vrot.slane %v2383_v54, 1  ;;  %v372_v63 = vld [vmem:[%s2863_s1] sm:$0xff]  ;;  %v736_v3 = vld [vmem:[%s2863_s1 + $0x1f8] sm:$0xff]  ;;  %v630_v4 = vld [vmem:[%s2863_s1 + $0x170] sm:$0xff] }
  0x48   : > { %1794 = vmatpush3.msra.mxu1 %v382_v35  ;;  %1757 = vmatprep.subr.mxu0 %v422_v36  ;;  %v735_v5 = vld [vmem:[%s2863_s1 + $0x1f0] sm:$0xff]  ;;  %v629_v6 = vld [vmem:[%s2863_s1 + $0x168] sm:$0xff]  ;;  %v628_v8 = vld [vmem:[%s2863_s1 + $0x160] sm:$0xff] }
  0x49   : > { %1795 = vmatprep.subr.mxu1 %v381_v37  ;;  %1758 = vmatpush3.msra.mxu0 %v422_v36  ;;  %v2406_v1 = vsel %vm396_vm0, %v400_v60, %v401_v61  ;;  %v734_v7 = vld [vmem:[%s2863_s1 + $0x1e8] sm:$0xff]  ;;  %v733_v9 = vld [vmem:[%s2863_s1 + $0x1e0] sm:$0xff]  ;;  %v627_v10 = vld [vmem:[%s2863_s1 + $0x158] sm:$0xff] }
  0x4a   : > { %1796 = vmatpush3.msra.mxu1 %v381_v37  ;;  %1759 = vmatprep.subr.mxu0 %v421_v38  ;;  %v732_v11 = vld [vmem:[%s2863_s1 + $0x1d8] sm:$0xff]  ;;  %v626_v12 = vld [vmem:[%s2863_s1 + $0x150] sm:$0xff]  ;;  %v625_v14 = vld [vmem:[%s2863_s1 + $0x148] sm:$0xff] }
  0x4b   : > { %1797 = vmatprep.subr.mxu1 %v380_v39  ;;  %1760 = vmatpush3.msra.mxu0 %v421_v38  ;;  %v731_v13 = vld [vmem:[%s2863_s1 + $0x1d0] sm:$0xff]  ;;  %v730_v15 = vld [vmem:[%s2863_s1 + $0x1c8] sm:$0xff]  ;;  %v624_v16 = vld [vmem:[%s2863_s1 + $0x140] sm:$0xff] }
  0x4c   : > { %1798 = vmatpush3.msra.mxu1 %v380_v39  ;;  %1761 = vmatprep.subr.mxu0 %v420_v40  ;;  %v729_v17 = vld [vmem:[%s2863_s1 + $0x1c0] sm:$0xff]  ;;  %v623_v18 = vld [vmem:[%s2863_s1 + $0x138] sm:$0xff]  ;;  %v622_v20 = vld [vmem:[%s2863_s1 + $0x130] sm:$0xff] }
  0x4d   : > { %1799 = vmatprep.subr.mxu1 %v379_v41  ;;  %1762 = vmatpush3.msra.mxu0 %v420_v40  ;;  %v728_v19 = vld [vmem:[%s2863_s1 + $0x1b8] sm:$0xff]  ;;  %v727_v21 = vld [vmem:[%s2863_s1 + $0x1b0] sm:$0xff]  ;;  %v2472_v22 = vld [vmem:[%s2278_s11 + $0x20] sm:$0xff]  ;;  %v600_v40 = vrot.slane %v2371_v50, 2 }
  0x4e   : > { %1800 = vmatpush3.msra.mxu1 %v379_v41  ;;  %1763 = vmatprep.subr.mxu0 %v419_v42  ;;  %v2475_v23 = vld [vmem:[%s2278_s11 + $0x28] sm:$0x3]  ;;  %v2484_v26 = vld [vmem:[%s2278_s11 + $0x30] sm:$0xff]  ;;  %v2487_v27 = vld [vmem:[%s2278_s11 + $0x38] sm:$0x3]  ;;  %v403_v30 = vrot.slane %v2472_v22, 1 }
  0x4f   : > { %1801 = vmatprep.subr.mxu1 %v378_v43  ;;  %1764 = vmatpush3.msra.mxu0 %v419_v42  ;;  %v621_v24 = vld [vmem:[%s2863_s1 + $0x128] sm:$0xff]  ;;  %v620_v28 = vld [vmem:[%s2863_s1 + $0x120] sm:$0xff]  ;;  %v404_v31 = vrot.slane %v2475_v23, 1  ;;  %v619_v32 = vld [vmem:[%s2863_s1 + $0x118] sm:$0xff]  ;;  %v406_v34 = vrot.slane %v2484_v26, 1  ;;  %v407_v35 = vrot.slane %v2487_v27, 1 }
  0x50   : > { %1802 = vmatpush3.msra.mxu1 %v378_v43  ;;  %1765 = vmatprep.subr.mxu0 %v418_v44  ;;  %v726_v25 = vld [vmem:[%s2863_s1 + $0x1a8] sm:$0xff]  ;;  %v725_v29 = vld [vmem:[%s2863_s1 + $0x1a0] sm:$0xff]  ;;  %v724_v33 = vld [vmem:[%s2863_s1 + $0x198] sm:$0xff]  ;;  %v601_v41 = vrot.slane %v2374_v51, 2  ;;  %v607_v51 = vrot.slane %v2475_v23, 2  ;;  %v610_v56 = vrot.slane %v2487_v27, 2 }
  0x51   : > { %1803 = vmatprep.subr.mxu1 %v377_v45  ;;  %1766 = vmatpush3.msra.mxu0 %v418_v44  ;;  %v2506_v36 = vsel %vm396_vm0, %v403_v30, %v404_v31  ;;  %v618_v37 = vld [vmem:[%s2863_s1 + $0x110] sm:$0xff]  ;;  %v2515_v39 = vsel %vm396_vm0, %v406_v34, %v407_v35  ;;  %v617_v42 = vld [vmem:[%s2863_s1 + $0x108] sm:$0xff]  ;;  %v604_v44 = vrot.slane %v2386_v55, 2  ;;  %v609_v55 = vrot.slane %v2484_v26, 2  ;;  %v941_v27 = vld [vmem:[%s2863_s1 + $0x280] sm:$0xff] }
  0x52   : > { %1804 = vmatpush3.msra.mxu1 %v377_v45  ;;  %1767 = vmatprep.subr.mxu0 %v417_v46  ;;  %v723_v38 = vld [vmem:[%s2863_s1 + $0x190] sm:$0xff]  ;;  %v722_v43 = vld [vmem:[%s2863_s1 + $0x188] sm:$0xff]  ;;  %v603_v45 = vrot.slane %v2383_v54, 2  ;;  %v1172_v30 = vld [vmem:[%s2863_s1 + $0x3f8] sm:$0xff] }
  0x53   : > { %1805 = vmatprep.subr.mxu1 %v376_v47  ;;  %1768 = vmatpush3.msra.mxu0 %v417_v46  ;;  %v616_v46 = vld [vmem:[%s2863_s1 + $0x100] sm:$0xff]  ;;  %v846_v57 = vld [vmem:[%s2863_s1 + $0x270] sm:$0xff]  ;;  %v845_v60 = vld [vmem:[%s2863_s1 + $0x268] sm:$0xff] }
  0x54   : > { %1806 = vmatpush3.msra.mxu1 %v376_v47  ;;  %1769 = vmatprep.subr.mxu0 %v416_v48  ;;  %v721_v47 = vld [vmem:[%s2863_s1 + $0x180] sm:$0xff]  ;;  %v954_v61 = vld [vmem:[%s2863_s1 + $0x2e8] sm:$0xff] }
  0x55   : > { %1807 = vmatprep.subr.mxu1 %v375_v49  ;;  %1770 = vmatpush3.msra.mxu0 %v416_v48  ;;  %v602_v48 = vsel %vm599_vm1, %v600_v40, %v601_v41  ;;  %v833_v23 = vld [vmem:[%s2863_s1 + $0x208] sm:$0xff]  ;;  %v1058_v41 = vld [vmem:[%s2863_s1 + $0x360] sm:$0xff] }
  0x56   : > { %1808 = vmatpush3.msra.mxu1 %v375_v49  ;;  %1771 = vmatprep.subr.mxu0 %v415_v52  ;;  %v2539_v49 = vsel %vm599_vm1, %v603_v45, %v604_v44  ;;  %v1170_v40 = vld [vmem:[%s2863_s1 + $0x3e8] sm:$0xff]  ;;  %v1057_v44 = vld [vmem:[%s2863_s1 + $0x358] sm:$0xff] }
  0x57   : > { %1809 = vmatprep.subr.mxu1 %v374_v53  ;;  %1772 = vmatpush3.msra.mxu0 %v415_v52  ;;  %v847_v52 = vld [vmem:[%s2863_s1 + $0x278] sm:$0xff] }
  0x58   : > { %1810 = vmatpush3.msra.mxu1 %v374_v53  ;;  %1773 = vmatprep.subr.mxu0 %v414_v58  ;;  %v956_v53 = vld [vmem:[%s2863_s1 + $0x2f8] sm:$0xff] }
  0x59   : > { %1811 = vmatprep.subr.mxu1 %v373_v59  ;;  %1774 = vmatpush3.msra.mxu0 %v414_v58  ;;  %v955_v58 = vld [vmem:[%s2863_s1 + $0x2f0] sm:$0xff]  ;;  %v1168_v45 = vld [vmem:[%s2863_s1 + $0x3d8] sm:$0xff] }
  0x5a   : > { %1812 = vmatpush3.msra.mxu1 %v373_v59  ;;  %1775 = vmatprep.subr.mxu0 %v413_v62 }
  0x5b   : > { %1813 = vmatprep.subr.mxu1 %v372_v63  ;;  %1776 = vmatpush3.msra.mxu0 %v413_v62  ;;  %v844_v62 = vld [vmem:[%s2863_s1 + $0x260] sm:$0xff] }
  0x5c   : > { %1777 = vmatprep.mubr.f32.mxu0 %v399_v0  ;;  %1814 = vmatpush3.msra.mxu1 %v372_v63  ;;  %v2578_v63 = vld [vmem:[%s2278_s11 + $0x40] sm:$0xff] }
  0x5d   : > { %1815 = vmatprep.mubr.f32.mxu1 %v2371_v50  ;;  %1778 = vmatmul.mubr.f32.vlgmr.msra.gmra.mxu0 %v2406_v1  ;;  %v606_v50 = vrot.slane %v2472_v22, 2  ;;  %v953_v0 = vld [vmem:[%s2863_s1 + $0x2e0] sm:$0xff]  ;;  %v828_v31 = vrot.slane %v2578_v63, 1  ;;  %v937_v35 = vrot.slane %v2578_v63, 2 }
  0x5e   : > { %1816 = vmatmul.mubr.f32.vlgmr.msra.gmra.mxu1 %v2383_v54  ;;  %1821 = vmatprep.subr.mxu0 %v631_v2 }
  0x5f   : > { %1859 = vmatprep.subr.mxu1 %v736_v3  ;;  %1822 = vmatpush3.msra.mxu0 %v631_v2  ;;  %v2561_v59 = vsel %vm599_vm1, %v606_v50, %v607_v51  ;;  %v843_v2 = vld [vmem:[%s2863_s1 + $0x258] sm:$0xff]  ;;  %v1054_v50 = vld [vmem:[%s2863_s1 + $0x340] sm:$0xff] }
  0x60   : > { %1860 = vmatpush3.msra.mxu1 %v736_v3  ;;  %1823 = vmatprep.subr.mxu0 %v630_v4  ;;  %v952_v3 = vld [vmem:[%s2863_s1 + $0x2d8] sm:$0xff]  ;;  %v1165_v51 = vld [vmem:[%s2863_s1 + $0x3c0] sm:$0xff] }
  0x61   : > { %1861 = vmatprep.subr.mxu1 %v735_v5  ;;  %1824 = vmatpush3.msra.mxu0 %v630_v4  ;;  %v842_v4 = vld [vmem:[%s2863_s1 + $0x250] sm:$0xff] }
  0x62   : > { %1862 = vmatpush3.msra.mxu1 %v735_v5  ;;  %1825 = vmatprep.subr.mxu0 %v629_v6  ;;  %v951_v5 = vld [vmem:[%s2863_s1 + $0x2d0] sm:$0xff] }
  0x63   : > { %1863 = vmatprep.subr.mxu1 %v734_v7  ;;  %1826 = vmatpush3.msra.mxu0 %v629_v6  ;;  %v841_v6 = vld [vmem:[%s2863_s1 + $0x248] sm:$0xff] }
  0x64   : > { %1864 = vmatpush3.msra.mxu1 %v734_v7  ;;  %1827 = vmatprep.subr.mxu0 %v628_v8  ;;  %v950_v7 = vld [vmem:[%s2863_s1 + $0x2c8] sm:$0xff] }
  0x65   : > { %1865 = vmatprep.subr.mxu1 %v733_v9  ;;  %1828 = vmatpush3.msra.mxu0 %v628_v8  ;;  %v840_v8 = vld [vmem:[%s2863_s1 + $0x240] sm:$0xff] }
  0x66   : > { %1866 = vmatpush3.msra.mxu1 %v733_v9  ;;  %1829 = vmatprep.subr.mxu0 %v627_v10  ;;  %v949_v9 = vld [vmem:[%s2863_s1 + $0x2c0] sm:$0xff] }
  0x67   : > { %1867 = vmatprep.subr.mxu1 %v732_v11  ;;  %1830 = vmatpush3.msra.mxu0 %v627_v10  ;;  %v839_v10 = vld [vmem:[%s2863_s1 + $0x238] sm:$0xff] }
  0x68   : > { %1868 = vmatpush3.msra.mxu1 %v732_v11  ;;  %1831 = vmatprep.subr.mxu0 %v626_v12  ;;  %v948_v11 = vld [vmem:[%s2863_s1 + $0x2b8] sm:$0xff] }
  0x69   : > { %1869 = vmatprep.subr.mxu1 %v731_v13  ;;  %1832 = vmatpush3.msra.mxu0 %v626_v12  ;;  %v838_v12 = vld [vmem:[%s2863_s1 + $0x230] sm:$0xff] }
  0x6a   : > { %1870 = vmatpush3.msra.mxu1 %v731_v13  ;;  %1833 = vmatprep.subr.mxu0 %v625_v14  ;;  %v947_v13 = vld [vmem:[%s2863_s1 + $0x2b0] sm:$0xff] }
  0x6b   : > { %1871 = vmatprep.subr.mxu1 %v730_v15  ;;  %1834 = vmatpush3.msra.mxu0 %v625_v14  ;;  %v837_v14 = vld [vmem:[%s2863_s1 + $0x228] sm:$0xff] }
  0x6c   : > { %1872 = vmatpush3.msra.mxu1 %v730_v15  ;;  %1835 = vmatprep.subr.mxu0 %v624_v16  ;;  %v946_v15 = vld [vmem:[%s2863_s1 + $0x2a8] sm:$0xff] }
  0x6d   : > { %1873 = vmatprep.subr.mxu1 %v729_v17  ;;  %1836 = vmatpush3.msra.mxu0 %v624_v16  ;;  %v836_v16 = vld [vmem:[%s2863_s1 + $0x220] sm:$0xff] }
  0x6e   : > { %1874 = vmatpush3.msra.mxu1 %v729_v17  ;;  %1837 = vmatprep.subr.mxu0 %v623_v18  ;;  %v945_v17 = vld [vmem:[%s2863_s1 + $0x2a0] sm:$0xff] }
  0x6f   : > { %1875 = vmatprep.subr.mxu1 %v728_v19  ;;  %1838 = vmatpush3.msra.mxu0 %v623_v18  ;;  %v835_v18 = vld [vmem:[%s2863_s1 + $0x218] sm:$0xff] }
  0x70   : > { %1876 = vmatpush3.msra.mxu1 %v728_v19  ;;  %1839 = vmatprep.subr.mxu0 %v622_v20  ;;  %v944_v19 = vld [vmem:[%s2863_s1 + $0x298] sm:$0xff] }
  0x71   : > { %1877 = vmatprep.subr.mxu1 %v727_v21  ;;  %1840 = vmatpush3.msra.mxu0 %v622_v20  ;;  %v834_v20 = vld [vmem:[%s2863_s1 + $0x210] sm:$0xff] }
  0x72   : > { %1878 = vmatpush3.msra.mxu1 %v727_v21  ;;  %1841 = vmatprep.subr.mxu0 %v621_v24  ;;  %v943_v21 = vld [vmem:[%s2863_s1 + $0x290] sm:$0xff] }
  0x73   : > { %1879 = vmatprep.subr.mxu1 %v726_v25  ;;  %1842 = vmatpush3.msra.mxu0 %v621_v24  ;;  %v942_v24 = vld [vmem:[%s2863_s1 + $0x288] sm:$0xff] }
  0x74   : > { %1880 = vmatpush3.msra.mxu1 %v726_v25  ;;  %1843 = vmatprep.subr.mxu0 %v620_v28  ;;  %v832_v25 = vld [vmem:[%s2863_s1 + $0x200] sm:$0xff] }
  0x75   : > { %1881 = vmatprep.subr.mxu1 %v725_v29  ;;  %1844 = vmatpush3.msra.mxu0 %v620_v28  ;;  %v369_v28 = vld [vmem:[%s2278_s11 + $0x48] sm:$0x3] }
  0x76   : > { %1882 = vmatpush3.msra.mxu1 %v725_v29  ;;  %1845 = vmatprep.subr.mxu0 %v619_v32  ;;  %v1061_v29 = vld [vmem:[%s2863_s1 + $0x378] sm:$0xff] }
  0x77   : > { %1883 = vmatprep.subr.mxu1 %v724_v33  ;;  %1846 = vmatpush3.msra.mxu0 %v619_v32  ;;  %v829_v32 = vrot.slane %v369_v28, 1 }
  0x78   : > { %1884 = vmatpush3.msra.mxu1 %v724_v33  ;;  %1780 = vmatprep.mubr.f32.mxu0 %v2506_v36  ;;  %v1171_v33 = vld [vmem:[%s2863_s1 + $0x3f0] sm:$0xff] }
  0x79   : > { %1818 = vmatprep.mubr.f32.mxu1 %v2472_v22  ;;  %1847 = vmatprep.subr.mxu0 %v618_v37  ;;  %v2676_v34 = vsel %vm396_vm0, %v828_v31, %v829_v32 }
  0x7a   : > { %1885 = vmatprep.subr.mxu1 %v723_v38  ;;  %1781 = vmatmul.mubr.f32.gmra.mxu0 %v2515_v39 }
  0x7b   : > { %1819 = vmatmul.mubr.f32.gmra.mxu1 %v2484_v26  ;;  %1848 = vmatpush3.msra.mxu0 %v618_v37  ;;  %v938_v37 = vrot.slane %v369_v28, 2 }
  0x7c   : > { %1886 = vmatpush3.msra.mxu1 %v723_v38  ;;  %1849 = vmatprep.subr.mxu0 %v617_v42  ;;  %v1059_v38 = vld [vmem:[%s2863_s1 + $0x368] sm:$0xff] }
  0x7d   : > { %1887 = vmatprep.subr.mxu1 %v722_v43  ;;  %1850 = vmatpush3.msra.mxu0 %v617_v42  ;;  %v2691_v42 = vsel %vm599_vm1, %v937_v35, %v938_v37 }
  0x7e   : > { %1888 = vmatpush3.msra.mxu1 %v722_v43  ;;  %1851 = vmatprep.subr.mxu0 %v616_v46  ;;  %v1169_v43 = vld [vmem:[%s2863_s1 + $0x3e0] sm:$0xff] }
  0x7f   : > { %1889 = vmatprep.subr.mxu1 %v721_v47  ;;  %1852 = vmatpush3.msra.mxu0 %v616_v46  ;;  %v1056_v46 = vld [vmem:[%s2863_s1 + $0x350] sm:$0xff] }
  0x80   : > { %1853 = vmatprep.mubr.f32.mxu0 %v602_v48  ;;  %1890 = vmatpush3.msra.mxu1 %v721_v47  ;;  %v1167_v47 = vld [vmem:[%s2863_s1 + $0x3d0] sm:$0xff]  ;;  %v1055_v48 = vld [vmem:[%s2863_s1 + $0x348] sm:$0xff] }
  0x81   : > { %1891 = vmatprep.mubr.f32.mxu1 %v2383_v54  ;;  %1854 = vmatmul.mubr.f32.vlgmr.msra.gmra.mxu0 %v2539_v49  ;;  %v2564_v54 = vsel %vm599_vm1, %v609_v55, %v610_v56  ;;  %v1052_v55 = vld [vmem:[%s2863_s1 + $0x330] sm:$0xff] }
  0x82   : > { %1892 = vmatmul.mubr.f32.vlgmr.msra.gmra.mxu1 %v2472_v22  ;;  %1897 = vmatprep.subr.mxu0 %v847_v52  ;;  %v1163_v56 = vld [vmem:[%s2863_s1 + $0x3b0] sm:$0xff] }
  0x83   : > { %1935 = vmatprep.subr.mxu1 %v956_v53  ;;  %1898 = vmatpush3.msra.mxu0 %v847_v52  ;;  %v1053_v52 = vld [vmem:[%s2863_s1 + $0x338] sm:$0xff] }
  0x84   : > { %1936 = vmatpush3.msra.mxu1 %v956_v53  ;;  %1899 = vmatprep.subr.mxu0 %v846_v57  ;;  %v1164_v53 = vld [vmem:[%s2863_s1 + $0x3b8] sm:$0xff] }
  0x85   : > { %1937 = vmatprep.subr.mxu1 %v955_v58  ;;  %1856 = vmatprep.mubr.f32.mxu0 %v2561_v59 }
  0x86   : > { %1900 = vmatpush3.msra.mxu0 %v846_v57  ;;  %1938 = vmatpush3.msra.mxu1 %v955_v58  ;;  %v1051_v57 = vld [vmem:[%s2863_s1 + $0x328] sm:$0xff] }
  0x87   : > { %1857 = vmatmul.mubr.f32.gmra.mxu0 %v2564_v54  ;;  %1901 = vmatprep.subr.mxu0 %v845_v60  ;;  %v1162_v58 = vld [vmem:[%s2863_s1 + $0x3a8] sm:$0xff] }
  0x88   : > { %1939 = vmatprep.subr.mxu1 %v954_v61  ;;  %1894 = vmatprep.mubr.f32.mxu1 %v2484_v26 }
  0x89   : > { %1902 = vmatpush3.msra.mxu0 %v845_v60  ;;  %1940 = vmatpush3.msra.mxu1 %v954_v61  ;;  %v1050_v60 = vld [vmem:[%s2863_s1 + $0x320] sm:$0xff] }
  0x8a   : > { %1903 = vmatprep.subr.mxu0 %v844_v62  ;;  %1895 = vmatmul.mubr.f32.gmra.mxu1 %v2578_v63  ;;  %v1161_v61 = vld [vmem:[%s2863_s1 + $0x3a0] sm:$0xff] }
  0x8b   : > { %1941 = vmatprep.subr.mxu1 %v953_v0  ;;  %1904 = vmatpush3.msra.mxu0 %v844_v62  ;;  %v1049_v62 = vld [vmem:[%s2863_s1 + $0x318] sm:$0xff] }
  0x8c   : > { %1942 = vmatpush3.msra.mxu1 %v953_v0  ;;  %1905 = vmatprep.subr.mxu0 %v843_v2  ;;  %v1160_v0 = vld [vmem:[%s2863_s1 + $0x398] sm:$0xff] }
  0x8d   : > { %1943 = vmatprep.subr.mxu1 %v952_v3  ;;  %1906 = vmatpush3.msra.mxu0 %v843_v2  ;;  %v1048_v2 = vld [vmem:[%s2863_s1 + $0x310] sm:$0xff] }
  0x8e   : > { %1944 = vmatpush3.msra.mxu1 %v952_v3  ;;  %1907 = vmatprep.subr.mxu0 %v842_v4  ;;  %v1159_v3 = vld [vmem:[%s2863_s1 + $0x390] sm:$0xff] }
  0x8f   : > { %1945 = vmatprep.subr.mxu1 %v951_v5  ;;  %1908 = vmatpush3.msra.mxu0 %v842_v4  ;;  %v1047_v4 = vld [vmem:[%s2863_s1 + $0x308] sm:$0xff] }
  0x90   : > { %1946 = vmatpush3.msra.mxu1 %v951_v5  ;;  %1909 = vmatprep.subr.mxu0 %v841_v6  ;;  %v1158_v5 = vld [vmem:[%s2863_s1 + $0x388] sm:$0xff] }
  0x91   : > { %1947 = vmatprep.subr.mxu1 %v950_v7  ;;  %1910 = vmatpush3.msra.mxu0 %v841_v6  ;;  %v1046_v6 = vld [vmem:[%s2863_s1 + $0x300] sm:$0xff] }
  0x92   : > { %1948 = vmatpush3.msra.mxu1 %v950_v7  ;;  %1911 = vmatprep.subr.mxu0 %v840_v8  ;;  %v1157_v7 = vld [vmem:[%s2863_s1 + $0x380] sm:$0xff] }
  0x93   : > { %1949 = vmatprep.subr.mxu1 %v949_v9  ;;  %1912 = vmatpush3.msra.mxu0 %v840_v8  ;;  %v1281_v8 = vld [vmem:[%s2863_s1 + $0x478] sm:$0xff] }
  0x94   : > { %1950 = vmatpush3.msra.mxu1 %v949_v9  ;;  %1913 = vmatprep.subr.mxu0 %v839_v10  ;;  %v2776_v9 = vld [vmem:[%s2278_s11 + $0x50] sm:$0xff] }
  0x95   : > { %1951 = vmatprep.subr.mxu1 %v948_v11  ;;  %1914 = vmatpush3.msra.mxu0 %v839_v10  ;;  %v2779_v10 = vld [vmem:[%s2278_s11 + $0x58] sm:$0x3] }
  0x96   : > { %1952 = vmatpush3.msra.mxu1 %v948_v11  ;;  %1915 = vmatprep.subr.mxu0 %v838_v12  ;;  %v1280_v11 = vld [vmem:[%s2863_s1 + $0x470] sm:$0xff] }
  0x97   : > { %1953 = vmatprep.subr.mxu1 %v947_v13  ;;  %1916 = vmatpush3.msra.mxu0 %v838_v12 }
  0x98   : > { %1954 = vmatpush3.msra.mxu1 %v947_v13  ;;  %1917 = vmatprep.subr.mxu0 %v837_v14  ;;  %v1276_v13 = vld [vmem:[%s2863_s1 + $0x450] sm:$0xff] }
  0x99   : > { %1955 = vmatprep.subr.mxu1 %v946_v15  ;;  %1918 = vmatpush3.msra.mxu0 %v837_v14  ;;  %v1275_v14 = vld [vmem:[%s2863_s1 + $0x448] sm:$0xff] }
  0x9a   : > { %1956 = vmatpush3.msra.mxu1 %v946_v15  ;;  %1919 = vmatprep.subr.mxu0 %v836_v16  ;;  %v1274_v15 = vld [vmem:[%s2863_s1 + $0x440] sm:$0xff] }
  0x9b   : > { %1957 = vmatprep.subr.mxu1 %v945_v17  ;;  %1920 = vmatpush3.msra.mxu0 %v836_v16  ;;  %v1273_v16 = vld [vmem:[%s2863_s1 + $0x438] sm:$0xff] }
  0x9c   : > { %1958 = vmatpush3.msra.mxu1 %v945_v17  ;;  %1921 = vmatprep.subr.mxu0 %v835_v18  ;;  %v1272_v17 = vld [vmem:[%s2863_s1 + $0x430] sm:$0xff] }
  0x9d   : > { %1959 = vmatprep.subr.mxu1 %v944_v19  ;;  %1922 = vmatpush3.msra.mxu0 %v835_v18  ;;  %v1271_v18 = vld [vmem:[%s2863_s1 + $0x428] sm:$0xff] }
  0x9e   : > { %1960 = vmatpush3.msra.mxu1 %v944_v19  ;;  %1923 = vmatprep.subr.mxu0 %v834_v20  ;;  %v1270_v19 = vld [vmem:[%s2863_s1 + $0x420] sm:$0xff] }
  0x9f   : > { %1961 = vmatprep.subr.mxu1 %v943_v21  ;;  %1924 = vmatpush3.msra.mxu0 %v834_v20  ;;  %v1269_v20 = vld [vmem:[%s2863_s1 + $0x418] sm:$0xff] }
  0xa0   : > { %1962 = vmatpush3.msra.mxu1 %v943_v21  ;;  %1925 = vmatprep.subr.mxu0 %v833_v23  ;;  %v1268_v21 = vld [vmem:[%s2863_s1 + $0x410] sm:$0xff] }
  0xa1   : > { %1963 = vmatprep.subr.mxu1 %v942_v24  ;;  %1926 = vmatpush3.msra.mxu0 %v833_v23  ;;  %v1267_v23 = vld [vmem:[%s2863_s1 + $0x408] sm:$0xff] }
  0xa2   : > { %1964 = vmatpush3.msra.mxu1 %v942_v24  ;;  %1927 = vmatprep.subr.mxu0 %v832_v25  ;;  %v1262_v24 = vrot.slane %v2776_v9, 2 }
  0xa3   : > { %1965 = vmatprep.subr.mxu1 %v941_v27  ;;  %1928 = vmatpush3.msra.mxu0 %v832_v25  ;;  %v1263_v25 = vrot.slane %v2779_v10, 2 }
  0xa4   : > { %1929 = vmatprep.mubr.f32.mxu0 %v2406_v1  ;;  %1966 = vmatpush3.msra.mxu1 %v941_v27  ;;  %v1060_v1 = vld [vmem:[%s2863_s1 + $0x370] sm:$0xff]  ;;  %v1266_v27 = vld [vmem:[%s2863_s1 + $0x400] sm:$0xff] }
  0xa5   : > { %1967 = vmatprep.mubr.f32.mxu1 %v2539_v49  ;;  %1930 = vmatmul.mubr.f32.vlgmr.msra.gmra.mxu0 %v2506_v36  ;;  %v1166_v49 = vld [vmem:[%s2863_s1 + $0x3c8] sm:$0xff]  ;;  %v1264_v28 = vsel %vm599_vm1, %v1262_v24, %v1263_v25 }
  0xa6   : > { %1968 = vmatmul.mubr.f32.vlgmr.msra.gmra.mxu1 %v2561_v59  ;;  %1973 = vmatprep.subr.mxu0 %v1061_v29 }
  0xa7   : > { %2011 = vmatprep.subr.mxu1 %v1172_v30  ;;  %1974 = vmatpush3.msra.mxu0 %v1061_v29 }
  0xa8   : > { %2012 = vmatpush3.msra.mxu1 %v1172_v30  ;;  %1975 = vmatprep.subr.mxu0 %v1060_v1 }
  0xa9   : > { %2013 = vmatprep.subr.mxu1 %v1171_v33  ;;  %1932 = vmatprep.mubr.f32.mxu0 %v2515_v39 }
  0xaa   : > { %1976 = vmatpush3.msra.mxu0 %v1060_v1  ;;  %2014 = vmatpush3.msra.mxu1 %v1171_v33 }
  0xab   : > { %1933 = vmatmul.mubr.f32.gmra.mxu0 %v2676_v34  ;;  %1977 = vmatprep.subr.mxu0 %v1059_v38 }
  0xac   : > { %2015 = vmatprep.subr.mxu1 %v1170_v40  ;;  %1970 = vmatprep.mubr.f32.mxu1 %v2564_v54 }
  0xad   : > { %1978 = vmatpush3.msra.mxu0 %v1059_v38  ;;  %2016 = vmatpush3.msra.mxu1 %v1170_v40 }
  0xae   : > { %1979 = vmatprep.subr.mxu0 %v1058_v41  ;;  %1971 = vmatmul.mubr.f32.gmra.mxu1 %v2691_v42 }
  0xaf   : > { %2017 = vmatprep.subr.mxu1 %v1169_v43  ;;  %1980 = vmatpush3.msra.mxu0 %v1058_v41 }
  0xb0   : > { %2018 = vmatpush3.msra.mxu1 %v1169_v43  ;;  %1981 = vmatprep.subr.mxu0 %v1057_v44 }
  0xb1   : > { %2019 = vmatprep.subr.mxu1 %v1168_v45  ;;  %1982 = vmatpush3.msra.mxu0 %v1057_v44 }
  0xb2   : > { %2020 = vmatpush3.msra.mxu1 %v1168_v45  ;;  %1983 = vmatprep.subr.mxu0 %v1056_v46 }
  0xb3   : > { %2021 = vmatprep.subr.mxu1 %v1167_v47  ;;  %1984 = vmatpush3.msra.mxu0 %v1056_v46 }
  0xb4   : > { %2022 = vmatpush3.msra.mxu1 %v1167_v47  ;;  %1985 = vmatprep.subr.mxu0 %v1055_v48 }
  0xb5   : > { %2023 = vmatprep.subr.mxu1 %v1166_v49  ;;  %1986 = vmatpush3.msra.mxu0 %v1055_v48 }
  0xb6   : > { %2024 = vmatpush3.msra.mxu1 %v1166_v49  ;;  %1987 = vmatprep.subr.mxu0 %v1054_v50 }
  0xb7   : > { %2025 = vmatprep.subr.mxu1 %v1165_v51  ;;  %1988 = vmatpush3.msra.mxu0 %v1054_v50 }
  0xb8   : > { %2026 = vmatpush3.msra.mxu1 %v1165_v51  ;;  %1989 = vmatprep.subr.mxu0 %v1053_v52 }
  0xb9   : > { %2027 = vmatprep.subr.mxu1 %v1164_v53  ;;  %1990 = vmatpush3.msra.mxu0 %v1053_v52 }
  0xba   : > { %2028 = vmatpush3.msra.mxu1 %v1164_v53  ;;  %1991 = vmatprep.subr.mxu0 %v1052_v55 }
  0xbb   : > { %2029 = vmatprep.subr.mxu1 %v1163_v56  ;;  %1992 = vmatpush3.msra.mxu0 %v1052_v55 }
  0xbc   : > { %2030 = vmatpush3.msra.mxu1 %v1163_v56  ;;  %1993 = vmatprep.subr.mxu0 %v1051_v57 }
  0xbd   : > { %2031 = vmatprep.subr.mxu1 %v1162_v58  ;;  %1994 = vmatpush3.msra.mxu0 %v1051_v57 }
  0xbe   : > { %2032 = vmatpush3.msra.mxu1 %v1162_v58  ;;  %1995 = vmatprep.subr.mxu0 %v1050_v60 }
  0xbf   : > { %2033 = vmatprep.subr.mxu1 %v1161_v61  ;;  %1996 = vmatpush3.msra.mxu0 %v1050_v60 }
  0xc0   : > { %2034 = vmatpush3.msra.mxu1 %v1161_v61  ;;  %1997 = vmatprep.subr.mxu0 %v1049_v62 }
  0xc1   : > { %2035 = vmatprep.subr.mxu1 %v1160_v0  ;;  %1998 = vmatpush3.msra.mxu0 %v1049_v62 }
  0xc2   : > { %2036 = vmatpush3.msra.mxu1 %v1160_v0  ;;  %1999 = vmatprep.subr.mxu0 %v1048_v2 }
  0xc3   : > { %2037 = vmatprep.subr.mxu1 %v1159_v3  ;;  %2000 = vmatpush3.msra.mxu0 %v1048_v2 }
  0xc4   : > { %2038 = vmatpush3.msra.mxu1 %v1159_v3  ;;  %2001 = vmatprep.subr.mxu0 %v1047_v4 }
  0xc5   : > { %2039 = vmatprep.subr.mxu1 %v1158_v5  ;;  %2002 = vmatpush3.msra.mxu0 %v1047_v4 }
  0xc6   : > { %2040 = vmatpush3.msra.mxu1 %v1158_v5  ;;  %2003 = vmatprep.subr.mxu0 %v1046_v6 }
  0xc7   : > { %2041 = vmatprep.subr.mxu1 %v1157_v7  ;;  %2004 = vmatpush3.msra.mxu0 %v1046_v6 }
  0xc8   : > { %2005 = vmatprep.mubr.f32.mxu0 %v2472_v22  ;;  %2042 = vmatpush3.msra.mxu1 %v1157_v7  ;;  %v1153_v22 = vrot.slane %v2776_v9, 1 }
  0xc9   : > { %2043 = vmatprep.mubr.f32.mxu1 %v2506_v36  ;;  %2006 = vmatmul.mubr.f32.vlgmr.msra.gmra.mxu0 %v2484_v26  ;;  %v1154_v36 = vrot.slane %v2779_v10, 1  ;;  %v1279_v26 = vld [vmem:[%s2863_s1 + $0x468] sm:$0xff] }
  0xca   : > { %2044 = vmatmul.mubr.f32.vlgmr.msra.gmra.mxu1 %v2515_v39  ;;  %2049 = vmatprep.subr.mxu0 %v1281_v8  ;;  %v1278_v39 = vld [vmem:[%s2863_s1 + $0x460] sm:$0xff] }
  0xcb   : > { %2087 = vmatprep.subr.mxu1 %v1281_v8  ;;  %2050 = vmatpush3.msra.mxu0 %v1281_v8  ;;  %v1155_v12 = vsel %vm396_vm0, %v1153_v22, %v1154_v36 }
  0xcc   : > { %2103 = vmatpush3.msra.mxu1 %v1281_v8  ;;  %2051 = vmatprep.subr.mxu0 %v1280_v11 }
  0xcd   : > { %2088 = vmatprep.subr.mxu1 %v1280_v11  ;;  %2008 = vmatprep.mubr.f32.mxu0 %v2578_v63  ;;  %v1277_v63 = vld [vmem:[%s2863_s1 + $0x458] sm:$0xff] }
  0xce   : > { %2052 = vmatpush3.msra.mxu0 %v1280_v11  ;;  %2104 = vmatpush3.msra.mxu1 %v1280_v11 }
  0xcf   : > { %2009 = vmatmul.mubr.f32.gmra.mxu0 %v2776_v9  ;;  %2053 = vmatprep.subr.mxu0 %v1279_v26 }
  0xd0   : > { %2089 = vmatprep.subr.mxu1 %v1279_v26  ;;  %2046 = vmatprep.mubr.f32.mxu1 %v2676_v34 }
  0xd1   : > { %2054 = vmatpush3.msra.mxu0 %v1279_v26  ;;  %2105 = vmatpush3.msra.mxu1 %v1279_v26 }
  0xd2   : > { %2055 = vmatprep.subr.mxu0 %v1278_v39  ;;  %2047 = vmatmul.mubr.f32.gmra.mxu1 %v1155_v12 }
  0xd3   : > { %2090 = vmatprep.subr.mxu1 %v1278_v39  ;;  %2056 = vmatpush3.msra.mxu0 %v1278_v39 }
  0xd4   : > { %2106 = vmatpush3.msra.mxu1 %v1278_v39  ;;  %2057 = vmatprep.subr.mxu0 %v1277_v63 }
  0xd5   : > { %2091 = vmatprep.subr.mxu1 %v1277_v63  ;;  %2058 = vmatpush3.msra.mxu0 %v1277_v63 }
  0xd6   : > { %2107 = vmatpush3.msra.mxu1 %v1277_v63  ;;  %2059 = vmatprep.subr.mxu0 %v1276_v13 }
  0xd7   : > { %2092 = vmatprep.subr.mxu1 %v1276_v13  ;;  %2060 = vmatpush3.msra.mxu0 %v1276_v13 }
  0xd8   : > { %2108 = vmatpush3.msra.mxu1 %v1276_v13  ;;  %2061 = vmatprep.subr.mxu0 %v1275_v14 }
  0xd9   : > { %2093 = vmatprep.subr.mxu1 %v1275_v14  ;;  %2062 = vmatpush3.msra.mxu0 %v1275_v14 }
  0xda   : > { %2109 = vmatpush3.msra.mxu1 %v1275_v14  ;;  %2063 = vmatprep.subr.mxu0 %v1274_v15 }
  0xdb   : > { %2094 = vmatprep.subr.mxu1 %v1274_v15  ;;  %2064 = vmatpush3.msra.mxu0 %v1274_v15 }
  0xdc   : > { %2110 = vmatpush3.msra.mxu1 %v1274_v15  ;;  %2065 = vmatprep.subr.mxu0 %v1273_v16 }
  0xdd   : > { %2095 = vmatprep.subr.mxu1 %v1273_v16  ;;  %2066 = vmatpush3.msra.mxu0 %v1273_v16 }
  0xde   : > { %2111 = vmatpush3.msra.mxu1 %v1273_v16  ;;  %2067 = vmatprep.subr.mxu0 %v1272_v17 }
  0xdf   : > { %2096 = vmatprep.subr.mxu1 %v1272_v17  ;;  %2068 = vmatpush3.msra.mxu0 %v1272_v17 }
  0xe0   : > { %2112 = vmatpush3.msra.mxu1 %v1272_v17  ;;  %2069 = vmatprep.subr.mxu0 %v1271_v18 }
  0xe1   : > { %2097 = vmatprep.subr.mxu1 %v1271_v18  ;;  %2070 = vmatpush3.msra.mxu0 %v1271_v18 }
  0xe2   : > { %2113 = vmatpush3.msra.mxu1 %v1271_v18  ;;  %2071 = vmatprep.subr.mxu0 %v1270_v19 }
  0xe3   : > { %2098 = vmatprep.subr.mxu1 %v1270_v19  ;;  %2072 = vmatpush3.msra.mxu0 %v1270_v19 }
  0xe4   : > { %2114 = vmatpush3.msra.mxu1 %v1270_v19  ;;  %2073 = vmatprep.subr.mxu0 %v1269_v20 }
  0xe5   : > { %2099 = vmatprep.subr.mxu1 %v1269_v20  ;;  %2074 = vmatpush3.msra.mxu0 %v1269_v20 }
  0xe6   : > { %2115 = vmatpush3.msra.mxu1 %v1269_v20  ;;  %2075 = vmatprep.subr.mxu0 %v1268_v21 }
  0xe7   : > { %2100 = vmatprep.subr.mxu1 %v1268_v21  ;;  %2076 = vmatpush3.msra.mxu0 %v1268_v21 }
  0xe8   : > { %2116 = vmatpush3.msra.mxu1 %v1268_v21  ;;  %2077 = vmatprep.subr.mxu0 %v1267_v23 }
  0xe9   : > { %2101 = vmatprep.subr.mxu1 %v1267_v23  ;;  %2078 = vmatpush3.msra.mxu0 %v1267_v23 }
  0xea   : > { %2117 = vmatpush3.msra.mxu1 %v1267_v23  ;;  %2079 = vmatprep.subr.mxu0 %v1266_v27  ;;  %v1560_v23 = vld [vmem:[%s2864_s2] ss:$0 sm:$0xff] }
  0xeb   : > { %2102 = vmatprep.subr.mxu1 %v1266_v27  ;;  %2080 = vmatpush3.msra.mxu0 %v1266_v27 }
  0xec   : > { %2118 = vmatpush3.msra.mxu1 %v1266_v27  ;;  %2081 = vmatprep.mubr.f32.mxu0 %v2561_v59 }
  0xed   : > { %2084 = vmatprep.mubr.f32.mxu1 %v2691_v42  ;;  %2082 = vmatmul.mubr.f32.vlgmr.msra.gmra.mxu0 %v2564_v54 }
  0xee   : > { %2085 = vmatmul.mubr.f32.vlgmr.msra.gmra.mxu1 %v1264_v28 }
 0x11d   : > { %v1779_v29 = vpop.f32.mrf.mxu0 }
 0x11e   : > { %v1817_v32 = vpop.f32.mrf.mxu1 }
 0x11f   : > { %v495_v30 = vpop.f32.mrf.mxu0  ;;  %v586_v50 = vadd.f32 %v1817_v32, %v1779_v29 }
 0x120   : > { %v580_v33 = vpop.f32.mrf.mxu1 }
 0x121   : > { %v581_v55 = vadd.f32 %v580_v33, %v495_v30 }
 0x13a   : > { %v1782_v31 = vpop.f32.mrf.mxu0 }
 0x13b   : > { %v1820_v35 = vpop.f32.mrf.mxu1 }
 0x13c   : > { %v505_v1 = vpop.f32.mrf.mxu0  ;;  %v596_v51 = vadd.f32 %v1820_v35, %v1782_v31 }
 0x13d   : > { %v590_v38 = vpop.f32.mrf.mxu1 }
 0x13e   : > { %v591_v56 = vadd.f32 %v590_v38, %v505_v1 }
 0x141   : > { %v1855_v34 = vpop.f32.mrf.mxu0 }
 0x142   : > { %v1893_v41 = vpop.f32.mrf.mxu1  ;;  %v718_v57 = vadd.f32 %v1855_v34, %v586_v50 }
 0x143   : > { %v698_v37 = vpop.f32.mrf.mxu0 }
 0x144   : > { %v803_v44 = vpop.f32.mrf.mxu1  ;;  %v717_v60 = vadd.f32 %v698_v37, %v581_v55  ;;  %v823_v2 = vadd.f32 %v1893_v41, %v718_v57 }
 0x146   : > { %v822_v5 = vadd.f32 %v803_v44, %v717_v60 }
 0x147   : > { %v1858_v40 = vpop.f32.mrf.mxu0 }
 0x148   : > { %v720_v58 = vadd.f32 %v1858_v40, %v596_v51 }
 0x149   : > { %v708_v43 = vpop.f32.mrf.mxu0 }
 0x14a   : > { %v1896_v45 = vpop.f32.mrf.mxu1  ;;  %v719_v61 = vadd.f32 %v708_v43, %v591_v56 }
 0x14b   : > { %v825_v3 = vadd.f32 %v1896_v45, %v720_v58 }
 0x14c   : > { %v813_v46 = vpop.f32.mrf.mxu1 }
 0x14d   : > { %v824_v6 = vadd.f32 %v813_v46, %v719_v61 }
 0x165   : > { %v1931_v59 = vpop.f32.mrf.mxu0 }
 0x166   : > { %v1969_v54 = vpop.f32.mrf.mxu1  ;;  %v934_v7 = vadd.f32 %v1931_v59, %v823_v2 }
 0x167   : > { %v914_v42 = vpop.f32.mrf.mxu0 }
 0x168   : > { %v1023_v48 = vpop.f32.mrf.mxu1  ;;  %v933_v10 = vadd.f32 %v914_v42, %v822_v5  ;;  %v1043_v36 = vadd.f32 %v1969_v54, %v934_v7 }
 0x16a   : > { %v1042_v63 = vadd.f32 %v1023_v48, %v933_v10 }
 0x16b   : > { %v1934_v47 = vpop.f32.mrf.mxu0 }
 0x16c   : > { %v936_v8 = vadd.f32 %v1934_v47, %v825_v3 }
 0x16d   : > { %v924_v49 = vpop.f32.mrf.mxu0 }
 0x16e   : > { %v1972_v52 = vpop.f32.mrf.mxu1  ;;  %v935_v11 = vadd.f32 %v924_v49, %v824_v6 }
 0x16f   : > { %v1045_v26 = vadd.f32 %v1972_v52, %v936_v8 }
 0x170   : > { %v1033_v62 = vpop.f32.mrf.mxu1 }
 0x171   : > { %v1044_v13 = vadd.f32 %v1033_v62, %v935_v11 }
 0x189   : > { %v2007_v53 = vpop.f32.mrf.mxu0 }
 0x18a   : > { %v2045_v4 = vpop.f32.mrf.mxu1  ;;  %v1148_v14 = vadd.f32 %v2007_v53, %v1043_v36 }
 0x18b   : > { %v1128_v0 = vpop.f32.mrf.mxu0 }
 0x18c   : > { %v1239_v22 = vpop.f32.mrf.mxu1  ;;  %v1147_v16 = vadd.f32 %v1128_v0, %v1042_v63  ;;  %v1259_v19 = vadd.f32 %v2045_v4, %v1148_v14 }
 0x18e   : > { %v1258_v25 = vadd.f32 %v1239_v22, %v1147_v16 }
 0x18f   : > { %v2010_v9 = vpop.f32.mrf.mxu0 }
 0x190   : > { %v1150_v15 = vadd.f32 %v2010_v9, %v1045_v26 }
 0x191   : > { %v1138_v39 = vpop.f32.mrf.mxu0 }
 0x192   : > { %v2048_v12 = vpop.f32.mrf.mxu1  ;;  %v1149_v17 = vadd.f32 %v1138_v39, %v1044_v13 }
 0x193   : > { %v1261_v20 = vadd.f32 %v2048_v12, %v1150_v15 }
 0x194   : > { %v1249_v18 = vpop.f32.mrf.mxu1 }
 0x195   : > { %v1260_v27 = vadd.f32 %v1249_v18, %v1149_v17 }
 0x1ad   : > { %v2083_v21 = vpop.f32.mrf.mxu0 }
 0x1ae   : > { %v2086_v24 = vpop.f32.mrf.mxu1  ;;  %v1368_v28 = vadd.f32 %v2083_v21, %v1259_v19 }
 0x1af   : > { %v1370_v29 = vadd.f32 %v2086_v24, %v1261_v20  ;;  %v1348_v30 = vpop.f32.mrf.mxu0 }
 0x1b0   : > { %v1358_v31 = vpop.f32.mrf.mxu1  ;;  %v1379_v32 = vadd.f32 %v1560_v23, %v1368_v28  ;;  %v1367_v33 = vadd.f32 %v1348_v30, %v1258_v25 }
 0x1b1   : > { %v1381_v1 = vadd.f32 %v1560_v23, %v1370_v29  ;;  %v1369_v34 = vadd.f32 %v1358_v31, %v1260_v27 }
 0x1b2   : > { %1383 = vst [vmem:[%s2265_s27 + $0x8] sm:$0xff] %v1379_v32  ;;  %v1378_v35 = vadd.f32 %v1560_v23, %v1367_v33 }
 0x1b3   : > { %1385 = vst [vmem:[%s2265_s27 + $0x18] sm:$0xff] %v1381_v1  ;;  %v1380_v37 = vadd.f32 %v1560_v23, %v1369_v34 }
 0x1b4   : > { %1382 = vst [vmem:[%s2265_s27] sm:$0xff] %v1378_v35 }
 0x1b5   : > { %1384 = vst [vmem:[%s2265_s27 + $0x10] sm:$0xff] %v1380_v37 }
 0x1b6 PF: > { %s13_s16 = sadd.s32 1, %s2199_s16   ;;  %s2866_s12 = smov %s2191_s14 }
 0x1b7   : > { %p10_p11 = scmp.ge.s32.totalorder %s13_s16, 6   ;;  %s2867_s13 = smov %s2195_s15 }
 0x1b8   : > { %s2868_s14 = smov %s2871_s17  ;;  %s2869_s15 = smov %s2875_s18 }
 0x1b9   :  { %12 = sbr.rel (!%p10_p11) target bundleno = 3 (0x3), region = 172 }
 0x1be   :  { %1416 = vsyncmov [#allocation3] }
 0x1c1   :  { %s1417_s27 = vpop.sfrf %1416 }
 0x1c2   :  { %p1563_p12 = scmp.ne.s32.totalorder %s1417_s27, 0 }
 0x1c4   :  { %1421 = shalt.err (%p1563_p12)  }
 0x1c5   :  { %1423 = vsyncmov [#allocation3 + $0x1] }
 0x1c8   :  { %s1424_s9 = vpop.sfrf %1423 }
 0x1c9   :  { %p1564_p13 = scmp.ne.s32.totalorder %s1424_s9, 0 }
 0x1cb   :  { %1428 = shalt.err (%p1564_p13)  }

</bundles_post_ra>
